<compile_context>
chip_gen: v6e
topology: v6e:2x2x1
jax: 0.10.0
libtpu: 0.0.40
codegen_flags: <defaults>
</compile_context>

<pallas_src>
import functools

import numpy as np
import jax
import jax.numpy as jnp
from jax import lax
from jax.experimental import pallas as pl
from jax.experimental.pallas import tpu as pltpu


# ---------------------------------------------------------------------------
# Kernel: 4 layers, each = one (BB*Ho, KH*Win*Cin) @ (KH*Win*Cin, Wout*Cout)
# ---------------------------------------------------------------------------
def _material_kernel(x_ref,
                     w1_ref, b1_ref, w2_ref, b2_ref,
                     w3_ref, b3_ref, w4_ref, b4_ref,
                     out_ref, *, bb, compute_dtype):
    """Fused 4-layer valid-conv forward.

    x_ref   : (1, BB*H0, W0*Cin)  f32   -- BB images stacked along rows
    wN_ref  : (KH*Win*Cin, Wout*Cout)   banded conv weights (compute_dtype)
    bN_ref  : (1, Wout*Cout)      f32   bias tiled over output columns
    out_ref : (1, BB*H4, Npad)    f32   lane-dense (Npad multiple of 128)
    """
    layers = ((w1_ref, b1_ref, True),
              (w2_ref, b2_ref, True),
              (w3_ref, b3_ref, True),
              (w4_ref, b4_ref, False))

    act = x_ref[0]                               # (bb*H0, W0*Cin) f32
    h_in = act.shape[0] // bb
    for (w_ref, b_ref, relu) in layers:
        k_small = act.shape[-1]                  # Win*Cin of this layer
        kh_total = w_ref.shape[0] // k_small     # kernel height
        ho = h_in - kh_total + 1

        act_c = act.astype(compute_dtype)        # one cast per layer (hoisted)

        # Build (bb*ho, KH*Win*Cin) lhs: per-image kh-shifted slices concat'd
        # along K, images concat'd along M.  All slices are static.
        per_image = []
        for b in range(bb):
            base = b * h_in
            shifts = [act_c[base + kh: base + kh + ho, :]
                      for kh in range(kh_total)]
            per_image.append(jnp.concatenate(shifts, axis=-1)
                             if kh_total > 1 else shifts[0])
        lhs = (jnp.concatenate(per_image, axis=0)
               if bb > 1 else per_image[0])

        acc = jnp.dot(lhs, w_ref[...],           # single MXU matmul per layer
                      preferred_element_type=jnp.float32)
        acc = acc + b_ref[...]                   # f32 epilogue
        if relu:
            acc = jnp.maximum(acc, 0.0)
        act = acc                                # (bb*ho, Wout*Cout) f32
        h_in = ho

    out_ref[0] = act.astype(out_ref.dtype)       # single lane-dense store


# ---------------------------------------------------------------------------
# Host-side weight lowering: valid conv -> banded matmul along width
# ---------------------------------------------------------------------------
def _lower_conv_to_band_matmul(w_hwio, b_vec, w_in):
    """wk[kh, wi*Cin+ci, wo*Cout+co] = w[kh, wi-wo, ci, co] (0 outside band)."""
    kh_, kw_, cin, cout = w_hwio.shape
    w_out = w_in - kw_ + 1
    w_np = np.asarray(w_hwio, np.float32)
    wk = np.zeros((kh_, w_in, cin, w_out, cout), np.float32)
    for wo in range(w_out):
        wk[:, wo:wo + kw_, :, wo, :] = w_np
    wk = wk.reshape(kh_, w_in * cin, w_out * cout)
    b_row = np.tile(np.asarray(b_vec, np.float32).reshape(-1),
                    w_out).reshape(1, w_out * cout)
    return wk, b_row, w_out


def prepare_params(params, H, W, compute_dtype=jnp.bfloat16, lane_pad_last=128):
    """Banded 2-D weights (KH*Win*Cin, Wout*Cout) per layer; last layer's
    columns zero-padded to a multiple of `lane_pad_last` for lane-dense stores."""
    prepped = []
    h, w_sp = H, W
    n_layers = len(params)
    for li, (wt, bv) in enumerate(params):
        wk, b_row, w_out = _lower_conv_to_band_matmul(wt, bv, w_sp)
        kh_, kin, n_cols = wk.shape
        wk2 = wk.reshape(kh_ * kin, n_cols)
        if li == n_layers - 1 and lane_pad_last:
            n_pad = ((n_cols + lane_pad_last - 1) // lane_pad_last) * lane_pad_last
            if n_pad != n_cols:                  # zero pad cols (and bias) only
                wk2 = np.pad(wk2, ((0, 0), (0, n_pad - n_cols)))
                b_row = np.pad(b_row, ((0, 0), (0, n_pad - n_cols)))
        prepped.append((jnp.asarray(wk2, dtype=compute_dtype),
                        jnp.asarray(b_row, dtype=jnp.float32)))
        h, w_sp = h - wt.shape[0] + 1, w_out
    return prepped, (h, w_sp)


# ---------------------------------------------------------------------------
# Wrapper
# ---------------------------------------------------------------------------
def material_sub_model(x_nchw, params, *, compute_dtype=jnp.bfloat16,
                       num_batch_blocks=1):
    """Forward pass of MaterialSubModel. x_nchw: (B, Cin, H, W) float32."""
    B, Cin, H, W = x_nchw.shape
    Cout = params[-1][0].shape[-1]
    prepped, (H_out, W_out) = prepare_params(params, H, W, compute_dtype)
    n_out = W_out * Cout                 # true output columns
    n_pad = prepped[-1][0].shape[1]      # lane-padded output columns

    assert B % num_batch_blocks == 0
    BB = B // num_batch_blocks           # images folded into M per grid step

    # NCHW -> lane-dense row-stacked planes: (num_blocks, BB*H, W*Cin)
    x2d = (jnp.transpose(x_nchw, (0, 2, 3, 1))
           .reshape(B, H, W * Cin)
           .reshape(num_batch_blocks, BB * H, W * Cin)
           .astype(jnp.float32))

    flat_args = []
    in_specs = [pl.BlockSpec((1, BB * H, W * Cin), lambda g: (g, 0, 0))]
    for (wk, b_row) in prepped:
        flat_args += [wk, b_row]
        in_specs.append(pl.BlockSpec(wk.shape, lambda g: (0, 0)))
        in_specs.append(pl.BlockSpec(b_row.shape, lambda g: (0, 0)))

    kernel = functools.partial(_material_kernel, bb=BB,
                               compute_dtype=compute_dtype)

    out = pl.pallas_call(
        kernel,
        grid=(num_batch_blocks,),
        in_specs=in_specs,
        out_specs=pl.BlockSpec((1, BB * H_out, n_pad), lambda g: (g, 0, 0)),
        out_shape=jax.ShapeDtypeStruct(
            (num_batch_blocks, BB * H_out, n_pad), jnp.float32),
        compiler_params=pltpu.CompilerParams(
            dimension_semantics=("parallel",),
            vmem_limit_bytes=32 * 1024 * 1024),
    )(x2d, *flat_args)

    out = out.reshape(B * H_out, n_pad)[:, :n_out]        # drop lane padding
    out = out.reshape(B, H_out, W_out, Cout)
    return jnp.transpose(out, (0, 3, 1, 2))               # back to NCHW


# ---------------------------------------------------------------------------
# Deterministic parameter init (PyTorch Conv2d default: U(-1/sqrt(fan_in), ..))
# ---------------------------------------------------------------------------
def init_params(key, in_channels, out_channels, c1=16, c2=32, c3=8):
    layer_defs = [  # (kh, kw, cin, cout)
        (3, 3, in_channels, c1),
        (4, 4, c1, c2),
        (4, 4, c2, c3),
        (3, 3, c3, out_channels),
    ]
    params = []
    for (kh, kw, ci, co) in layer_defs:
        key, kw_key, kb_key = jax.random.split(key, 3)
        fan_in = kh * kw * ci
        bound = 1.0 / jnp.sqrt(fan_in)
        w = jax.random.uniform(kw_key, (kh, kw, ci, co), jnp.float32,
                               minval=-bound, maxval=bound)   # HWIO
        b = jax.random.uniform(kb_key, (co,), jnp.float32,
                               minval=-bound, maxval=bound)
        params.append((w, b))
    return params


def _reference_forward(x_nchw, params):
    """Pure-JAX reference (lax.conv) for correctness checking."""
    x = x_nchw.astype(jnp.float32)
    dn = lax.conv_dimension_numbers(x.shape, params[0][0].shape,
                                    ("NCHW", "HWIO", "NCHW"))
    for i, (w, b) in enumerate(params):
        x = lax.conv_general_dilated(x, w, window_strides=(1, 1),
                                     padding="VALID", dimension_numbers=dn,
                                     precision=lax.Precision.HIGHEST)
        x = x + b.reshape(1, -1, 1, 1)
        if i < 3:
            x = jnp.maximum(x, 0.0)
    return x


# ---------------------------------------------------------------------------
if __name__ == "__main__":
    B, IN_CH, OUT_CH, H, W = 2, 4, 16, 16, 16
    B, IN_CH, OUT_CH, H, W = 2, 4, 2, 16, 16

    key = jax.random.PRNGKey(0)
    key, xkey = jax.random.split(key)
    x = jax.random.normal(xkey, (B, IN_CH, H, W), jnp.float32)
    params = init_params(key, IN_CH, OUT_CH)

    ref = jax.block_until_ready(_reference_forward(x, params))
    assert ref.shape == (B, OUT_CH, 6, 6), ref.shape

    # 1) Default bf16 MXU path (recommended on v5e/v6e/v7x): bf16 matmul
    #    inputs + bf16 banded weights, f32 accumulate/bias/ReLU epilogue.
    out_bf16 = jax.block_until_ready(material_sub_model(x, params))
    assert out_bf16.shape == ref.shape, out_bf16.shape
    assert jnp.allclose(out_bf16, ref, atol=3e-2, rtol=5e-2), \
        float(jnp.max(jnp.abs(out_bf16 - ref)))

    # 2) f32 path for tight numerical check.
    out_f32 = jax.block_until_ready(
        material_sub_model(x, params, compute_dtype=jnp.float32))
    assert jnp.allclose(out_f32, ref, atol=5e-4, rtol=1e-4), \
        float(jnp.max(jnp.abs(out_f32 - ref)))

    # 3) 2-way split across the parallel grid axis (both TensorCores on v7x).
    out_split = jax.block_until_ready(
        material_sub_model(x, params, compute_dtype=jnp.float32,
                           num_batch_blocks=2))
    assert jnp.allclose(out_split, ref, atol=5e-4, rtol=1e-4), \
        float(jnp.max(jnp.abs(out_split - ref)))

    print("KERNEL_OK")
</pallas_src>

<mosaic_0001>
module attributes {stable_mosaic.version = 11 : i64} {
  func.func @_material_kernel(%arg0: i32, %arg1: memref<1x32x64xf32, #tpu.memory_space<vmem>>, %arg2: memref<192x224xbf16, #tpu.memory_space<vmem>>, %arg3: memref<1x224xf32, #tpu.memory_space<vmem>>, %arg4: memref<896x352xbf16, #tpu.memory_space<vmem>>, %arg5: memref<1x352xf32, #tpu.memory_space<vmem>>, %arg6: memref<1408x64xbf16, #tpu.memory_space<vmem>>, %arg7: memref<1x64xf32, #tpu.memory_space<vmem>>, %arg8: memref<192x128xbf16, #tpu.memory_space<vmem>>, %arg9: memref<1x128xf32, #tpu.memory_space<vmem>>, %arg10: memref<1x12x128xf32, #tpu.memory_space<vmem>>) attributes {dimension_semantics = [#tpu.dimension_semantics<parallel>], iteration_bounds = array<i64: 1>, scalar_prefetch = 0 : i64, scratch_operands = 0 : i64, tpu.core_type = #tpu.core_type<tc>, window_params = [{transform_indices = @transform_0, window_bounds = array<i64: 1, 32, 64>}, {pipeline_mode = #tpu.pipeline_mode<synchronous>, transform_indices = @transform_1, window_bounds = array<i64: 192, 224>}, {pipeline_mode = #tpu.pipeline_mode<synchronous>, transform_indices = @transform_2, window_bounds = array<i64: 1, 224>}, {pipeline_mode = #tpu.pipeline_mode<synchronous>, transform_indices = @transform_3, window_bounds = array<i64: 896, 352>}, {pipeline_mode = #tpu.pipeline_mode<synchronous>, transform_indices = @transform_4, window_bounds = array<i64: 1, 352>}, {pipeline_mode = #tpu.pipeline_mode<synchronous>, transform_indices = @transform_5, window_bounds = array<i64: 1408, 64>}, {pipeline_mode = #tpu.pipeline_mode<synchronous>, transform_indices = @transform_6, window_bounds = array<i64: 1, 64>}, {pipeline_mode = #tpu.pipeline_mode<synchronous>, transform_indices = @transform_7, window_bounds = array<i64: 192, 128>}, {pipeline_mode = #tpu.pipeline_mode<synchronous>, transform_indices = @transform_8, window_bounds = array<i64: 1, 128>}, {transform_indices = @transform_9, window_bounds = array<i64: 1, 12, 128>}]} {
    %c0 = arith.constant 0 : index
    %c0_0 = arith.constant 0 : index
    %c0_1 = arith.constant 0 : index
    %0 = vector.load %arg1[%c0, %c0_0, %c0_1] : memref<1x32x64xf32, #tpu.memory_space<vmem>>, vector<1x32x64xf32>
    %1 = vector.shape_cast %0 : vector<1x32x64xf32> to vector<32x64xf32>
    %2 = arith.truncf %1 : vector<32x64xf32> to vector<32x64xbf16>
    %3 = vector.extract_strided_slice %2 {offsets = [0, 0], sizes = [14, 64], strides = [1, 1]} : vector<32x64xbf16> to vector<14x64xbf16>
    %4 = vector.extract_strided_slice %2 {offsets = [1, 0], sizes = [14, 64], strides = [1, 1]} : vector<32x64xbf16> to vector<14x64xbf16>
    %5 = vector.extract_strided_slice %2 {offsets = [2, 0], sizes = [14, 64], strides = [1, 1]} : vector<32x64xbf16> to vector<14x64xbf16>
    %6 = tpu.concatenate %3, %4, %5 in 1 : vector<14x64xbf16>, vector<14x64xbf16>, vector<14x64xbf16> -> vector<14x192xbf16>
    %7 = vector.extract_strided_slice %2 {offsets = [16, 0], sizes = [14, 64], strides = [1, 1]} : vector<32x64xbf16> to vector<14x64xbf16>
    %8 = vector.extract_strided_slice %2 {offsets = [17, 0], sizes = [14, 64], strides = [1, 1]} : vector<32x64xbf16> to vector<14x64xbf16>
    %9 = vector.extract_strided_slice %2 {offsets = [18, 0], sizes = [14, 64], strides = [1, 1]} : vector<32x64xbf16> to vector<14x64xbf16>
    %10 = tpu.concatenate %7, %8, %9 in 1 : vector<14x64xbf16>, vector<14x64xbf16>, vector<14x64xbf16> -> vector<14x192xbf16>
    %11 = tpu.concatenate %6, %10 in 0 : vector<14x192xbf16>, vector<14x192xbf16> -> vector<28x192xbf16>
    %c0_2 = arith.constant 0 : index
    %c0_3 = arith.constant 0 : index
    %12 = vector.load %arg2[%c0_2, %c0_3] : memref<192x224xbf16, #tpu.memory_space<vmem>>, vector<192x224xbf16>
    %cst = arith.constant dense<0.000000e+00> : vector<28x224xf32>
    %13 = tpu.matmul %11, %12, %cst {dimension_numbers = #tpu.dot_dimension_numbers<[1], [0], [0], [1], [0, 0, 1, 1], [], []>} : vector<28x192xbf16>, vector<192x224xbf16>, vector<28x224xf32> -> vector<28x224xf32>
    %c0_4 = arith.constant 0 : index
    %c0_5 = arith.constant 0 : index
    %14 = vector.load %arg3[%c0_4, %c0_5] : memref<1x224xf32, #tpu.memory_space<vmem>>, vector<1x224xf32>
    %15 = vector.broadcast %14 : vector<1x224xf32> to vector<28x224xf32>
    %16 = arith.addf %13, %15 : vector<28x224xf32>
    %cst_6 = arith.constant 0.000000e+00 : f32
    %17 = vector.broadcast %cst_6 : f32 to vector<28x224xf32>
    %18 = arith.maximumf %16, %17 : vector<28x224xf32>
    %19 = arith.truncf %18 : vector<28x224xf32> to vector<28x224xbf16>
    %20 = vector.extract_strided_slice %19 {offsets = [0, 0], sizes = [11, 224], strides = [1, 1]} : vector<28x224xbf16> to vector<11x224xbf16>
    %21 = vector.extract_strided_slice %19 {offsets = [1, 0], sizes = [11, 224], strides = [1, 1]} : vector<28x224xbf16> to vector<11x224xbf16>
    %22 = vector.extract_strided_slice %19 {offsets = [2, 0], sizes = [11, 224], strides = [1, 1]} : vector<28x224xbf16> to vector<11x224xbf16>
    %23 = vector.extract_strided_slice %19 {offsets = [3, 0], sizes = [11, 224], strides = [1, 1]} : vector<28x224xbf16> to vector<11x224xbf16>
    %24 = tpu.concatenate %20, %21, %22, %23 in 1 : vector<11x224xbf16>, vector<11x224xbf16>, vector<11x224xbf16>, vector<11x224xbf16> -> vector<11x896xbf16>
    %25 = vector.extract_strided_slice %19 {offsets = [14, 0], sizes = [11, 224], strides = [1, 1]} : vector<28x224xbf16> to vector<11x224xbf16>
    %26 = vector.extract_strided_slice %19 {offsets = [15, 0], sizes = [11, 224], strides = [1, 1]} : vector<28x224xbf16> to vector<11x224xbf16>
    %27 = vector.extract_strided_slice %19 {offsets = [16, 0], sizes = [11, 224], strides = [1, 1]} : vector<28x224xbf16> to vector<11x224xbf16>
    %28 = vector.extract_strided_slice %19 {offsets = [17, 0], sizes = [11, 224], strides = [1, 1]} : vector<28x224xbf16> to vector<11x224xbf16>
    %29 = tpu.concatenate %25, %26, %27, %28 in 1 : vector<11x224xbf16>, vector<11x224xbf16>, vector<11x224xbf16>, vector<11x224xbf16> -> vector<11x896xbf16>
    %30 = tpu.concatenate %24, %29 in 0 : vector<11x896xbf16>, vector<11x896xbf16> -> vector<22x896xbf16>
    %c0_7 = arith.constant 0 : index
    %c0_8 = arith.constant 0 : index
    %31 = vector.load %arg4[%c0_7, %c0_8] : memref<896x352xbf16, #tpu.memory_space<vmem>>, vector<896x352xbf16>
    %cst_9 = arith.constant dense<0.000000e+00> : vector<22x352xf32>
    %32 = tpu.matmul %30, %31, %cst_9 {dimension_numbers = #tpu.dot_dimension_numbers<[1], [0], [0], [1], [0, 0, 1, 1], [], []>} : vector<22x896xbf16>, vector<896x352xbf16>, vector<22x352xf32> -> vector<22x352xf32>
    %c0_10 = arith.constant 0 : index
    %c0_11 = arith.constant 0 : index
    %33 = vector.load %arg5[%c0_10, %c0_11] : memref<1x352xf32, #tpu.memory_space<vmem>>, vector<1x352xf32>
    %34 = vector.broadcast %33 : vector<1x352xf32> to vector<22x352xf32>
    %35 = arith.addf %32, %34 : vector<22x352xf32>
    %cst_12 = arith.constant 0.000000e+00 : f32
    %36 = vector.broadcast %cst_12 : f32 to vector<22x352xf32>
    %37 = arith.maximumf %35, %36 : vector<22x352xf32>
    %38 = arith.truncf %37 : vector<22x352xf32> to vector<22x352xbf16>
    %39 = vector.extract_strided_slice %38 {offsets = [0, 0], sizes = [8, 352], strides = [1, 1]} : vector<22x352xbf16> to vector<8x352xbf16>
    %40 = vector.extract_strided_slice %38 {offsets = [1, 0], sizes = [8, 352], strides = [1, 1]} : vector<22x352xbf16> to vector<8x352xbf16>
    %41 = vector.extract_strided_slice %38 {offsets = [2, 0], sizes = [8, 352], strides = [1, 1]} : vector<22x352xbf16> to vector<8x352xbf16>
    %42 = vector.extract_strided_slice %38 {offsets = [3, 0], sizes = [8, 352], strides = [1, 1]} : vector<22x352xbf16> to vector<8x352xbf16>
    %43 = tpu.concatenate %39, %40, %41, %42 in 1 : vector<8x352xbf16>, vector<8x352xbf16>, vector<8x352xbf16>, vector<8x352xbf16> -> vector<8x1408xbf16>
    %44 = vector.extract_strided_slice %38 {offsets = [11, 0], sizes = [8, 352], strides = [1, 1]} : vector<22x352xbf16> to vector<8x352xbf16>
    %45 = vector.extract_strided_slice %38 {offsets = [12, 0], sizes = [8, 352], strides = [1, 1]} : vector<22x352xbf16> to vector<8x352xbf16>
    %46 = vector.extract_strided_slice %38 {offsets = [13, 0], sizes = [8, 352], strides = [1, 1]} : vector<22x352xbf16> to vector<8x352xbf16>
    %47 = vector.extract_strided_slice %38 {offsets = [14, 0], sizes = [8, 352], strides = [1, 1]} : vector<22x352xbf16> to vector<8x352xbf16>
    %48 = tpu.concatenate %44, %45, %46, %47 in 1 : vector<8x352xbf16>, vector<8x352xbf16>, vector<8x352xbf16>, vector<8x352xbf16> -> vector<8x1408xbf16>
    %49 = tpu.concatenate %43, %48 in 0 : vector<8x1408xbf16>, vector<8x1408xbf16> -> vector<16x1408xbf16>
    %c0_13 = arith.constant 0 : index
    %c0_14 = arith.constant 0 : index
    %50 = vector.load %arg6[%c0_13, %c0_14] : memref<1408x64xbf16, #tpu.memory_space<vmem>>, vector<1408x64xbf16>
    %cst_15 = arith.constant dense<0.000000e+00> : vector<16x64xf32>
    %51 = tpu.matmul %49, %50, %cst_15 {dimension_numbers = #tpu.dot_dimension_numbers<[1], [0], [0], [1], [0, 0, 1, 1], [], []>} : vector<16x1408xbf16>, vector<1408x64xbf16>, vector<16x64xf32> -> vector<16x64xf32>
    %c0_16 = arith.constant 0 : index
    %c0_17 = arith.constant 0 : index
    %52 = vector.load %arg7[%c0_16, %c0_17] : memref<1x64xf32, #tpu.memory_space<vmem>>, vector<1x64xf32>
    %53 = vector.broadcast %52 : vector<1x64xf32> to vector<16x64xf32>
    %54 = arith.addf %51, %53 : vector<16x64xf32>
    %cst_18 = arith.constant 0.000000e+00 : f32
    %55 = vector.broadcast %cst_18 : f32 to vector<16x64xf32>
    %56 = arith.maximumf %54, %55 : vector<16x64xf32>
    %57 = arith.truncf %56 : vector<16x64xf32> to vector<16x64xbf16>
    %58 = vector.extract_strided_slice %57 {offsets = [0, 0], sizes = [6, 64], strides = [1, 1]} : vector<16x64xbf16> to vector<6x64xbf16>
    %59 = vector.extract_strided_slice %57 {offsets = [1, 0], sizes = [6, 64], strides = [1, 1]} : vector<16x64xbf16> to vector<6x64xbf16>
    %60 = vector.extract_strided_slice %57 {offsets = [2, 0], sizes = [6, 64], strides = [1, 1]} : vector<16x64xbf16> to vector<6x64xbf16>
    %61 = tpu.concatenate %58, %59, %60 in 1 : vector<6x64xbf16>, vector<6x64xbf16>, vector<6x64xbf16> -> vector<6x192xbf16>
    %62 = vector.extract_strided_slice %57 {offsets = [8, 0], sizes = [6, 64], strides = [1, 1]} : vector<16x64xbf16> to vector<6x64xbf16>
    %63 = vector.extract_strided_slice %57 {offsets = [9, 0], sizes = [6, 64], strides = [1, 1]} : vector<16x64xbf16> to vector<6x64xbf16>
    %64 = vector.extract_strided_slice %57 {offsets = [10, 0], sizes = [6, 64], strides = [1, 1]} : vector<16x64xbf16> to vector<6x64xbf16>
    %65 = tpu.concatenate %62, %63, %64 in 1 : vector<6x64xbf16>, vector<6x64xbf16>, vector<6x64xbf16> -> vector<6x192xbf16>
    %66 = tpu.concatenate %61, %65 in 0 : vector<6x192xbf16>, vector<6x192xbf16> -> vector<12x192xbf16>
    %c0_19 = arith.constant 0 : index
    %c0_20 = arith.constant 0 : index
    %67 = vector.load %arg8[%c0_19, %c0_20] : memref<192x128xbf16, #tpu.memory_space<vmem>>, vector<192x128xbf16>
    %cst_21 = arith.constant dense<0.000000e+00> : vector<12x128xf32>
    %68 = tpu.matmul %66, %67, %cst_21 {dimension_numbers = #tpu.dot_dimension_numbers<[1], [0], [0], [1], [0, 0, 1, 1], [], []>} : vector<12x192xbf16>, vector<192x128xbf16>, vector<12x128xf32> -> vector<12x128xf32>
    %c0_22 = arith.constant 0 : index
    %c0_23 = arith.constant 0 : index
    %69 = vector.load %arg9[%c0_22, %c0_23] : memref<1x128xf32, #tpu.memory_space<vmem>>, vector<1x128xf32>
    %70 = vector.broadcast %69 : vector<1x128xf32> to vector<12x128xf32>
    %71 = arith.addf %68, %70 : vector<12x128xf32>
    %c0_24 = arith.constant 0 : index
    %c0_25 = arith.constant 0 : index
    %c0_26 = arith.constant 0 : index
    %72 = vector.load %arg10[%c0_24, %c0_25, %c0_26] : memref<1x12x128xf32, #tpu.memory_space<vmem>>, vector<1x12x128xf32>
    %73 = vector.shape_cast %72 : vector<1x12x128xf32> to vector<12x128xf32>
    %74 = vector.shape_cast %71 : vector<12x128xf32> to vector<1x12x128xf32>
    tpu.vector_store %arg10[%c0_24, %c0_25, %c0_26], %74 {strides = array<i32>} : memref<1x12x128xf32, #tpu.memory_space<vmem>>, vector<1x12x128xf32>,
    return
  }
  func.func @transform_0(%arg0: i32) -> (i32, i32, i32) {
    %c0_i32 = arith.constant 0 : i32
    %c0_i32_0 = arith.constant 0 : i32
    %c0_i32_1 = arith.constant 0 : i32
    return %arg0, %c0_i32, %c0_i32_0 : i32, i32, i32
  }
  func.func @transform_1(%arg0: i32) -> (i32, i32) {
    %c0_i32 = arith.constant 0 : i32
    %c0_i32_0 = arith.constant 0 : i32
    %c0_i32_1 = arith.constant 0 : i32
    return %c0_i32, %c0_i32_0 : i32, i32
  }
  func.func @transform_2(%arg0: i32) -> (i32, i32) {
    %c0_i32 = arith.constant 0 : i32
    %c0_i32_0 = arith.constant 0 : i32
    %c0_i32_1 = arith.constant 0 : i32
    return %c0_i32, %c0_i32_0 : i32, i32
  }
  func.func @transform_3(%arg0: i32) -> (i32, i32) {
    %c0_i32 = arith.constant 0 : i32
    %c0_i32_0 = arith.constant 0 : i32
    %c0_i32_1 = arith.constant 0 : i32
    return %c0_i32, %c0_i32_0 : i32, i32
  }
  func.func @transform_4(%arg0: i32) -> (i32, i32) {
    %c0_i32 = arith.constant 0 : i32
    %c0_i32_0 = arith.constant 0 : i32
    %c0_i32_1 = arith.constant 0 : i32
    return %c0_i32, %c0_i32_0 : i32, i32
  }
  func.func @transform_5(%arg0: i32) -> (i32, i32) {
    %c0_i32 = arith.constant 0 : i32
    %c0_i32_0 = arith.constant 0 : i32
    %c0_i32_1 = arith.constant 0 : i32
    return %c0_i32, %c0_i32_0 : i32, i32
  }
  func.func @transform_6(%arg0: i32) -> (i32, i32) {
    %c0_i32 = arith.constant 0 : i32
    %c0_i32_0 = arith.constant 0 : i32
    %c0_i32_1 = arith.constant 0 : i32
    return %c0_i32, %c0_i32_0 : i32, i32
  }
  func.func @transform_7(%arg0: i32) -> (i32, i32) {
    %c0_i32 = arith.constant 0 : i32
    %c0_i32_0 = arith.constant 0 : i32
    %c0_i32_1 = arith.constant 0 : i32
    return %c0_i32, %c0_i32_0 : i32, i32
  }
  func.func @transform_8(%arg0: i32) -> (i32, i32) {
    %c0_i32 = arith.constant 0 : i32
    %c0_i32_0 = arith.constant 0 : i32
    %c0_i32_1 = arith.constant 0 : i32
    return %c0_i32, %c0_i32_0 : i32, i32
  }
  func.func @transform_9(%arg0: i32) -> (i32, i32, i32) {
    %c0_i32 = arith.constant 0 : i32
    %c0_i32_0 = arith.constant 0 : i32
    %c0_i32_1 = arith.constant 0 : i32
    return %arg0, %c0_i32, %c0_i32_0 : i32, i32, i32
  }
}

</mosaic_0001>

<bundles_post_ra>
// kernel: tpu_custom_call.1
= control target key start
LH: loop header
LB: loop body
LE: loop exit
PB: predicated region body
PF: predicated region fallthrough
CT: control target
= control target key end

     0   :  { %s4482_s26 = smov 64   ;;  %vm70_vm0 = vcmask 1046528   ;;  %vm50_vm1 = vcmask 523264   ;;  %vm360_vm2 = vsmask.f32 7424  ;;  %vm508_vm5 = vcmask 1045504   ;;  %s5879_s0 = inlined_call_operand.vmem [shape: f32[1,32,64], index: 0, kind: input, shape index: {}]   ;;  %s5880_s1 = inlined_call_operand.vmem [shape: bf16[192,224], index: 1, kind: input, shape index: {}]   ;;  %s5881_s3 = inlined_call_operand.vmem [shape: bf16[896,352], index: 3, kind: input, shape index: {}]   ;;  %s5882_s2 = inlined_call_operand.vmem [shape: f32[1,224], index: 2, kind: input, shape index: {}]   ;;  %s5883_s5 = inlined_call_operand.vmem [shape: bf16[1408,64], index: 5, kind: input, shape index: {}]   ;;  %s5884_s4 = inlined_call_operand.vmem [shape: f32[1,352], index: 4, kind: input, shape index: {}]   ;;  %s5885_s7 = inlined_call_operand.vmem [shape: bf16[192,128], index: 7, kind: input, shape index: {}]   ;;  %s5886_s6 = inlined_call_operand.vmem [shape: f32[1,64], index: 6, kind: input, shape index: {}]   ;;  %s5887_s8 = inlined_call_operand.vmem [shape: f32[1,128], index: 8, kind: input, shape index: {}]   ;;  %s5888_s9 = inlined_call_operand.vmem [shape: f32[1,12,128], index: 9, kind: output, shape index: {}]  }
   0x1   :  { %v35_v0 = vld [vmem:[%s5879_s0 + $0x10] sm:$0xff]  ;;  %v36_v1 = vld [vmem:[%s5879_s0 + $0x18] sm:$0xff]  ;;  %v33_v2 = vld [vmem:[%s5879_s0] sm:$0xff]  ;;  %vm419_vm3 = vsmask.f32 6400  ;;  %vm320_vm7 = vcmask 785408  }
   0x2   :  { %v4547_v3 = vpack.c.bf16 %v36_v1, %v35_v0  ;;  %v34_v4 = vld [vmem:[%s5879_s0 + $0x8] sm:$0xff]  ;;  %v4122_v6 = vld [vmem:[%s5880_s1 + $0x74] ss:$8 sps:$4 sm:$0xff]   ;;  %v4124_v7 = vld [vmem:[%s5880_s1 + $0x70] ss:$8 sps:$4 sm:$0xff]   ;;  %s4484_s0 = smov 32  }
   0x3   :  { %v4552_v5 = vpack.c.bf16 %v34_v4, %v33_v2  ;;  %v4125_v10 = vld [vmem:[%s5880_s1 + $0x64] ss:$8 sps:$4 sm:$0xff]   ;;  %237 = vmatprep.subr.bf16.mxu0 %v4122_v6  ;;  %v4127_v14 = vld [vmem:[%s5880_s1 + $0x60] ss:$8 sps:$4 sm:$0xff]   ;;  %v4128_v16 = vld [vmem:[%s5880_s1 + $0x54] ss:$8 sps:$4 sm:$0xff]  }
   0x4   :  { %v54_v8 = vshrl.u32 %v4547_v3, 16  ;;  %v56_v9 = vshll.u32 %v4547_v3, 16  ;;  %238 = vmatpush1.bf16.msra.mxu0 %v4124_v7  ;;  %v63_v19 = vrot.slane %v4547_v3, 1  ;;  %v4130_v21 = vld [vmem:[%s5880_s1 + $0x50] ss:$8 sps:$4 sm:$0xff]   ;;  %vm344_vm8 = vcmask 261120  }
   0x5   :  { %v42_v11 = vshll.u32 %v4552_v5, 16  ;;  %v40_v13 = vshrl.u32 %v4552_v5, 16  ;;  %239 = vmatprep.subr.bf16.mxu0 %v4125_v10  ;;  %v49_v18 = vrot.slane %v4552_v5, 1  ;;  %v4131_v22 = vld [vmem:[%s5880_s1 + $0x44] ss:$8 sps:$4 sm:$0xff]   ;;  %vm2391_vm9 = vcmask 1043456  }
   0x6   :  { %v58_v12 = vrot.slane %v56_v9, 1  ;;  %v68_v23 = vrot.slane %v63_v19, 1  ;;  %v4133_v25 = vld [vmem:[%s5880_s1 + $0x40] ss:$8 sps:$4 sm:$0xff]   ;;  %v4134_v26 = vld [vmem:[%s5880_s1 + $0x34] ss:$8 sps:$4 sm:$0xff]  }
   0x7   :  { %v44_v15 = vrot.slane %v42_v11, 1  ;;  %v4136_v27 = vld [vmem:[%s5880_s1 + $0x30] ss:$8 sps:$4 sm:$0xff]   ;;  %v4137_v28 = vld [vmem:[%s5880_s1 + $0x24] ss:$8 sps:$4 sm:$0xff]   ;;  %vm4487_vm10 = vmmov 0  }
   0x8   :  { %v59_v17 = vor.u32 %v58_v12, %v54_v8  ;;  %240 = vmatpush1.bf16.msra.mxu0 %v4127_v14  ;;  %v76_v24 = vsel %vm70_vm0, %v49_v18, %v68_v23  ;;  %v4139_v29 = vld [vmem:[%s5880_s1 + $0x20] ss:$8 sps:$4 sm:$0xff]   ;;  %v4140_v30 = vld [vmem:[%s5880_s1 + $0x14] ss:$8 sps:$4 sm:$0xff]   ;;  %v4142_v31 = vld [vmem:[%s5880_s1 + $0x10] ss:$8 sps:$4 sm:$0xff]  }
   0x9   :  { %v45_v20 = vor.u32 %v44_v15, %v40_v13  ;;  %241 = vmatprep.subr.bf16.mxu0 %v4128_v16  ;;  %3590 = vmatprep.mubr.msk.bf16.mxu0 %vm50_vm1, %v76_v24  ;;  %v4143_v32 = vld [vmem:[%s5880_s1 + $0x4] ss:$8 sps:$4 sm:$0xff]   ;;  %v4145_v33 = vld [vmem:[%s5880_s1] ss:$8 sps:$4 sm:$0xff]   ;;  %v4146_v34 = vld [vmem:[%s5880_s1 + $0xb4] ss:$8 sps:$4 sm:$0xff]   ;;  %v103_v24 = vlaneseq }
   0xa   :  { %60 = vrot.lane.b32.xlu0 %v59_v17, %s4482_s26  ;;  %v4148_v35 = vld [vmem:[%s5880_s1 + $0xb0] ss:$8 sps:$4 sm:$0xff]   ;;  %v4149_v36 = vld [vmem:[%s5880_s1 + $0xa4] ss:$8 sps:$4 sm:$0xff]   ;;  %v4151_v37 = vld [vmem:[%s5880_s1 + $0xa0] ss:$8 sps:$4 sm:$0xff]  }
   0xb   :  { %v4152_v38 = vld [vmem:[%s5880_s1 + $0x94] ss:$8 sps:$4 sm:$0xff]   ;;  %v4154_v39 = vld [vmem:[%s5880_s1 + $0x90] ss:$8 sps:$4 sm:$0xff]   ;;  %v4155_v40 = vld [vmem:[%s5880_s1 + $0x84] ss:$8 sps:$4 sm:$0xff]  }
   0xc   :  { %242 = vmatpush1.bf16.msra.mxu0 %v4130_v21  ;;  %v4157_v41 = vld [vmem:[%s5880_s1 + $0x80] ss:$8 sps:$4 sm:$0xff]   ;;  %v4158_v48 = vld [vmem:[%s5881_s3 + $0xac] ss:$12 sps:$4 sm:$0xff]   ;;  %v4163_v51 = vld [vmem:[%s5881_s3 + $0x90] ss:$12 sps:$4 sm:$0xff]  }
   0xd   :  { %243 = vmatprep.subr.bf16.mxu0 %v4131_v22  ;;  %v4160_v49 = vld [vmem:[%s5881_s3 + $0xa8] ss:$12 sps:$4 sm:$0xff]   ;;  %1655 = vmatprep.subr.bf16.mxu1 %v4158_v48  ;;  %v4168_v54 = vld [vmem:[%s5881_s3 + $0x22c] ss:$12 sps:$4 sm:$0xff]   ;;  %v4172_v56 = vld [vmem:[%s5881_s3 + $0x210] ss:$12 sps:$4 sm:$0xff]  }
   0xe   :  { %46 = vrot.lane.b32.xlu0 %v45_v20, %s4482_s26  ;;  %v4161_v50 = vld [vmem:[%s5881_s3 + $0x94] ss:$12 sps:$4 sm:$0xff]   ;;  %1656 = vmatpush1.bf16.msra.mxu1 %v4160_v49  ;;  %v4164_v52 = vld [vmem:[%s5881_s3 + $0x7c] ss:$12 sps:$4 sm:$0xff]   ;;  %v4169_v55 = vld [vmem:[%s5881_s3 + $0x78] ss:$12 sps:$4 sm:$0xff]  }
   0xf   :  { %1657 = vmatprep.subr.bf16.mxu1 %v4161_v50  ;;  %v4166_v53 = vld [vmem:[%s5881_s3 + $0x228] ss:$12 sps:$4 sm:$0xff]   ;;  %v4170_v58 = vld [vmem:[%s5881_s3 + $0x64] ss:$12 sps:$4 sm:$0xff]   ;;  %v4175_v59 = vld [vmem:[%s5881_s3 + $0x60] ss:$12 sps:$4 sm:$0xff]  }
  0x10   :  { %244 = vmatpush1.bf16.msra.mxu0 %v4133_v25  ;;  %v4174_v57 = vld [vmem:[%s5881_s3 + $0x214] ss:$12 sps:$4 sm:$0xff]   ;;  %v4180_v60 = vld [vmem:[%s5881_s3 + $0x1fc] ss:$12 sps:$4 sm:$0xff]   ;;  %v4178_v61 = vld [vmem:[%s5881_s3 + $0x1f8] ss:$12 sps:$4 sm:$0xff]  }
  0x11   :  { %245 = vmatprep.subr.bf16.mxu0 %v4134_v26  ;;  %v4176_v62 = vld [vmem:[%s5881_s3 + $0x4c] ss:$12 sps:$4 sm:$0xff]   ;;  %v4186_v63 = vld [vmem:[%s5881_s3 + $0x1e4] ss:$12 sps:$4 sm:$0xff]   ;;  %v4181_v0 = vld [vmem:[%s5881_s3 + $0x48] ss:$12 sps:$4 sm:$0xff]  }
  0x12   :  { %1658 = vmatpush1.bf16.msra.mxu1 %v4163_v51  ;;  %v4182_v1 = vld [vmem:[%s5881_s3 + $0x34] ss:$12 sps:$4 sm:$0xff]   ;;  %v4187_v4 = vld [vmem:[%s5881_s3 + $0x30] ss:$12 sps:$4 sm:$0xff]   ;;  %v4193_v8 = vld [vmem:[%s5881_s3 + $0x18] ss:$12 sps:$4 sm:$0xff]  }
  0x13   :  { %1659 = vmatprep.subr.bf16.mxu1 %v4164_v52  ;;  %v4184_v2 = vld [vmem:[%s5881_s3 + $0x1e0] ss:$12 sps:$4 sm:$0xff]   ;;  %v4188_v6 = vld [vmem:[%s5881_s3 + $0x1c] ss:$12 sps:$4 sm:$0xff]   ;;  %v4194_v9 = vld [vmem:[%s5881_s3 + $0x4] ss:$12 sps:$4 sm:$0xff]  }
  0x14   :  { %246 = vmatpush1.bf16.msra.mxu0 %v4136_v27  ;;  %v4198_v7 = vld [vmem:[%s5881_s3 + $0x1b4] ss:$12 sps:$4 sm:$0xff]   ;;  %v4196_v10 = vld [vmem:[%s5881_s3 + $0x1b0] ss:$12 sps:$4 sm:$0xff]   ;;  %v4200_v13 = vld [vmem:[%s5881_s3 + $0x16c] ss:$12 sps:$4 sm:$0xff]  }
  0x15   :  { %247 = vmatprep.subr.bf16.mxu0 %v4137_v28  ;;  %v4204_v11 = vld [vmem:[%s5881_s3 + $0x19c] ss:$12 sps:$4 sm:$0xff]   ;;  %v4199_v12 = vld [vmem:[%s5881_s3] ss:$12 sps:$4 sm:$0xff]   ;;  %v4202_v14 = vld [vmem:[%s5881_s3 + $0x198] ss:$12 sps:$4 sm:$0xff]  }
  0x16   :  { %1660 = vmatpush1.bf16.msra.mxu1 %v4169_v55  ;;  %v4210_v15 = vld [vmem:[%s5881_s3 + $0x184] ss:$12 sps:$4 sm:$0xff]   ;;  %v4205_v16 = vld [vmem:[%s5881_s3 + $0x168] ss:$12 sps:$4 sm:$0xff]   ;;  %v4208_v17 = vld [vmem:[%s5881_s3 + $0x180] ss:$12 sps:$4 sm:$0xff]  }
  0x17   :  { %1661 = vmatprep.subr.bf16.mxu1 %v4170_v58  ;;  %v4206_v18 = vld [vmem:[%s5881_s3 + $0x154] ss:$12 sps:$4 sm:$0xff]   ;;  %v4216_v19 = vld [vmem:[%s5881_s3 + $0x2ec] ss:$12 sps:$4 sm:$0xff]   ;;  %v4211_v20 = vld [vmem:[%s5881_s3 + $0x150] ss:$12 sps:$4 sm:$0xff]  }
  0x18   :  { %248 = vmatpush1.bf16.msra.mxu0 %v4139_v29  ;;  %v4214_v21 = vld [vmem:[%s5881_s3 + $0x2e8] ss:$12 sps:$4 sm:$0xff]   ;;  %v4762_v25 = vshrl.u32 %v103_v24, 7  ;;  %v101_v28 = vld [vmem:[%s5882_s2] sm:$0x3]  ;;  %s4483_s1 = smov 96  }
  0x19   :  { %249 = vmatprep.subr.bf16.mxu0 %v4140_v30  ;;  %v4212_v22 = vld [vmem:[%s5881_s3 + $0x13c] ss:$12 sps:$4 sm:$0xff]   ;;  %v4230_v55 = vld [vmem:[%s5881_s3 + $0xf4] ss:$12 sps:$4 sm:$0xff]   ;;  %vm509_vm4 = vsmask.f32 5376 }
  0x1a   :  { %1662 = vmatpush1.bf16.msra.mxu1 %v4175_v59  ;;  %v105_v26 = vsub.s32 0, %v4762_v25  ;;  %v109_v27 = vsub.s32 1, %v4762_v25  ;;  %vm4858_vm6 = vmand %vm508_vm5, %vm509_vm4  ;;  %vm3407_vm11 = vcmask 1042432  }
  0x1b   :  { %1663 = vmatprep.subr.bf16.mxu1 %v4176_v62  ;;  %v4235_v62 = vld [vmem:[%s5881_s3 + $0xf0] ss:$12 sps:$4 sm:$0xff]  }
  0x1c   :  { %250 = vmatpush1.bf16.msra.mxu0 %v4142_v31  ;;  %v106_v29 = vrot.slane %v101_v28, %v105_v26  ;;  %v110_v31 = vrot.slane %v101_v28, %v109_v27 }
  0x1d   :  { %251 = vmatprep.subr.bf16.mxu0 %v4143_v32 }
  0x1e   :  { %1664 = vmatpush1.bf16.msra.mxu1 %v4181_v0 }
  0x1f   :  { %1665 = vmatprep.subr.bf16.mxu1 %v4182_v1 }
  0x20   :  { %252 = vmatpush1.bf16.msra.mxu0 %v4145_v33 }
  0x21   :  { %261 = vmatprep.subr.bf16.mxu0 %v4146_v34  ;;  %v4218_v34 = vld [vmem:[%s5881_s3 + $0x124] ss:$12 sps:$4 sm:$0xff]  }
  0x22   :  { %1666 = vmatpush1.bf16.msra.mxu1 %v4187_v4 }
  0x23   :  { %1667 = vmatprep.subr.bf16.mxu1 %v4188_v6  ;;  %v4236_v6 = vld [vmem:[%s5881_s3 + $0xdc] ss:$12 sps:$4 sm:$0xff]  }
  0x24   :  { %262 = vmatpush2.bf16.msra.mxu0 %v4148_v35  ;;  %v4222_v35 = vld [vmem:[%s5881_s3 + $0x2d4] ss:$12 sps:$4 sm:$0xff]  }
  0x25   :  { %263 = vmatprep.subr.bf16.mxu0 %v4149_v36 }
  0x26   :  { %1668 = vmatpush1.bf16.msra.mxu1 %v4193_v8 }
  0x27   :  { %1669 = vmatprep.subr.bf16.mxu1 %v4194_v9 }
  0x28   :  { %264 = vmatpush2.bf16.msra.mxu0 %v4151_v37  ;;  %v4220_v37 = vld [vmem:[%s5881_s3 + $0x2d0] ss:$12 sps:$4 sm:$0xff]  }
  0x29   :  { %265 = vmatprep.subr.bf16.mxu0 %v4152_v38  ;;  %v4223_v38 = vld [vmem:[%s5881_s3 + $0x120] ss:$12 sps:$4 sm:$0xff]  }
  0x2a   :  { %1670 = vmatpush1.bf16.msra.mxu1 %v4199_v12 }
  0x2b   :  { %1671 = vmatprep.subr.bf16.mxu1 %v4200_v13 }
  0x2c   :  { %266 = vmatpush2.bf16.msra.mxu0 %v4154_v39 }
  0x2d   :  { %267 = vmatprep.subr.bf16.mxu0 %v4155_v40 }
  0x2e   :  { %1672 = vmatpush2.bf16.msra.mxu1 %v4205_v16 }
  0x2f   :  { %1673 = vmatprep.subr.bf16.mxu1 %v4206_v18 }
  0x30   :  { %268 = vmatpush2.bf16.msra.mxu0 %v4157_v41  ;;  %v4224_v41 = vld [vmem:[%s5881_s3 + $0x10c] ss:$12 sps:$4 sm:$0xff]  }
  0x31   :  { %1706 = vmatprep.subr.bf16.mxu0 %v4168_v54 }
  0x32   :  { %1674 = vmatpush2.bf16.msra.mxu1 %v4211_v20  ;;  %v4242_v20 = vld [vmem:[%s5881_s3 + $0xc4] ss:$12 sps:$4 sm:$0xff]  }
  0x33   :  { %1675 = vmatprep.subr.bf16.mxu1 %v4212_v22  ;;  %v4246_v22 = vld [vmem:[%s5881_s3 + $0x274] ss:$12 sps:$4 sm:$0xff]  }
  0x7c   :  { %v61_v42 = vpop.permute.xlu0 %60 }
  0x7d   :  { %v65_v43 = vsel %vm50_vm1, %v4547_v3, %v61_v42  ;;  %v4192_v3 = vld [vmem:[%s5881_s3 + $0x1cc] ss:$12 sps:$4 sm:$0xff]  }
  0x7e   :  { %v67_v44 = vrot.slane %v65_v43, 1  ;;  %v4226_v42 = vld [vmem:[%s5881_s3 + $0x2b8] ss:$12 sps:$4 sm:$0xff]  }
  0x80   :  { %v47_v45 = vpop.permute.xlu0 %46 }
  0x81   :  { %v52_v46 = vsel %vm50_vm1, %v4552_v5, %v47_v45  ;;  %v4190_v5 = vld [vmem:[%s5881_s3 + $0x1c8] ss:$12 sps:$4 sm:$0xff]  }
  0x82   :  { %v72_v47 = vsel %vm70_vm0, %v52_v46, %v67_v44  ;;  %v4229_v45 = vld [vmem:[%s5881_s3 + $0x108] ss:$12 sps:$4 sm:$0xff]  }
  0x83   :  { %270 = vmatmul.mubr.bf16.vlgmr.msra.gmra.mxu0 %v72_v47 }
  0x84   :  { %3591 = vmatprep.mubr.msk.bf16.mxu0 %vm50_vm1, %v68_v23  ;;  %1707 = vmatpush1.bf16.msra.mxu0 %v4166_v53  ;;  %v4217_v23 = vld [vmem:[%s5881_s3 + $0x138] ss:$12 sps:$4 sm:$0xff]  }
  0x85   :  { %1708 = vmatprep.subr.bf16.mxu0 %v4174_v57  ;;  %1676 = vmatpush2.bf16.msra.mxu1 %v4217_v23  ;;  %v4247_v23 = vld [vmem:[%s5881_s3 + $0xc0] ss:$12 sps:$4 sm:$0xff]  }
  0x86   :  { %1677 = vmatprep.subr.bf16.mxu1 %v4218_v34  ;;  %v4250_v34 = vld [vmem:[%s5881_s3 + $0x25c] ss:$12 sps:$4 sm:$0xff]  }
  0x88   :  { %1709 = vmatpush1.bf16.msra.mxu0 %v4172_v56  ;;  %v4234_v56 = vld [vmem:[%s5881_s3 + $0x2a4] ss:$12 sps:$4 sm:$0xff]  }
  0x89   :  { %1710 = vmatprep.subr.bf16.mxu0 %v4180_v60  ;;  %1678 = vmatpush2.bf16.msra.mxu1 %v4223_v38 }
  0x8a   :  { %1679 = vmatprep.subr.bf16.mxu1 %v4224_v41 }
  0x8b   :  { %280 = vmatmul.mubr.bf16.gmra.mxu0 %v67_v44  ;;  %v4228_v44 = vld [vmem:[%s5881_s3 + $0x2bc] ss:$12 sps:$4 sm:$0xff]  }
  0x8c   :  { %1711 = vmatpush1.bf16.msra.mxu0 %v4178_v61  ;;  %v4232_v61 = vld [vmem:[%s5881_s3 + $0x2a0] ss:$12 sps:$4 sm:$0xff]  }
  0x8d   :  { %1712 = vmatprep.subr.bf16.mxu0 %v4186_v63  ;;  %1680 = vmatpush2.bf16.msra.mxu1 %v4229_v45 }
  0x8e   :  { %1681 = vmatprep.subr.bf16.mxu1 %v4230_v55 }
  0x90   :  { %1713 = vmatpush1.bf16.msra.mxu0 %v4184_v2 }
  0x91   :  { %1714 = vmatprep.subr.bf16.mxu0 %v4192_v3  ;;  %1682 = vmatpush2.bf16.msra.mxu1 %v4235_v62 }
  0x92   :  { %1683 = vmatprep.subr.bf16.mxu1 %v4236_v6 }
  0x94   :  { %1715 = vmatpush1.bf16.msra.mxu0 %v4190_v5 }
  0x95   :  { %1716 = vmatprep.subr.bf16.mxu0 %v4198_v7 }
  0x98   :  { %1717 = vmatpush1.bf16.msra.mxu0 %v4196_v10  ;;  %v4238_v10 = vld [vmem:[%s5881_s3 + $0x288] ss:$12 sps:$4 sm:$0xff]  }
  0x99   :  { %1718 = vmatprep.subr.bf16.mxu0 %v4204_v11  ;;  %v4240_v11 = vld [vmem:[%s5881_s3 + $0x28c] ss:$12 sps:$4 sm:$0xff]  }
  0x9c   :  { %1719 = vmatpush1.bf16.msra.mxu0 %v4202_v14 }
  0x9d   :  { %1720 = vmatprep.subr.bf16.mxu0 %v4210_v15  ;;  %v4241_v15 = vld [vmem:[%s5881_s3 + $0xd8] ss:$12 sps:$4 sm:$0xff]  }
  0x9e   :  { %1684 = vmatpush2.bf16.msra.mxu1 %v4241_v15 }
  0x9f   :  { %1685 = vmatprep.subr.bf16.mxu1 %v4242_v20 }
  0xa0   :  { %1721 = vmatpush1.bf16.msra.mxu0 %v4208_v17 }
  0xa1   :  { %1722 = vmatprep.subr.bf16.mxu0 %v4216_v19 }
  0xa2   :  { %1686 = vmatpush2.bf16.msra.mxu1 %v4247_v23 }
  0xa4   :  { %1723 = vmatpush2.bf16.msra.mxu0 %v4214_v21  ;;  %v4244_v21 = vld [vmem:[%s5881_s3 + $0x270] ss:$12 sps:$4 sm:$0xff]  }
  0xa5   :  { %1724 = vmatprep.subr.bf16.mxu0 %v4222_v35  ;;  %v4253_v35 = vld [vmem:[%s5881_s3 + $0x3ac] ss:$12 sps:$4 sm:$0xff]  }
  0xa6   :  { %1757 = vmatprep.subr.bf16.mxu1 %v4253_v35 }
  0xa8   :  { %1725 = vmatpush2.bf16.msra.mxu0 %v4220_v37 }
  0xa9   :  { %1726 = vmatprep.subr.bf16.mxu0 %v4228_v44 }
  0xac   :  { %1727 = vmatpush2.bf16.msra.mxu0 %v4226_v42 }
  0xad   :  { %1728 = vmatprep.subr.bf16.mxu0 %v4234_v56 }
  0xb0   :  { %1729 = vmatpush2.bf16.msra.mxu0 %v4232_v61 }
  0xb1   :  { %1730 = vmatprep.subr.bf16.mxu0 %v4240_v11 }
  0xb4   :  { %1731 = vmatpush2.bf16.msra.mxu0 %v4238_v10 }
  0xb5   :  { %1732 = vmatprep.subr.bf16.mxu0 %v4246_v22 }
  0xb8   :  { %1733 = vmatpush2.bf16.msra.mxu0 %v4244_v21 }
  0xb9   :  { %1734 = vmatprep.subr.bf16.mxu0 %v4250_v34 }
 0x143   :  { %v271_v30 = vpop.f32.mrf.mxu0 }
 0x144   :  { %v272_v33 = vadd.f32 %v271_v30, %v106_v29 }
 0x145   :  { %v273_v32 = vpop.f32.mrf.mxu0 }
 0x146   :  { %v274_v39 = vadd.f32 %v273_v32, %v110_v31  ;;  %v290_v46 = vmax.f32 %v272_v33, 0.0 }
 0x147   :  { %v275_v36 = vpop.f32.mrf.mxu0 }
 0x148   :  { %v276_v40 = vadd.f32 %v275_v36, %v106_v29  ;;  %v291_v50 = vmax.f32 %v274_v39, 0.0  ;;  %v4344_v39 = vld [vmem:[%s5881_s3 + $0x98] ss:$12 sps:$4 sm:$0xff]  }
 0x149   :  { %v277_v43 = vpop.f32.mrf.mxu0 }
 0x14a   :  { %v292_v47 = vmax.f32 %v276_v40, 0.0  ;;  %v278_v48 = vadd.f32 %v277_v43, %v110_v31  ;;  %v4248_v40 = vld [vmem:[%s5881_s3 + $0x258] ss:$12 sps:$4 sm:$0xff]  }
 0x14b   :  { %v281_v49 = vpop.f32.mrf.mxu0  ;;  %1735 = vmatpush2.bf16.msra.mxu0 %v4248_v40 }
 0x14c   :  { %v4797_v51 = vpack.c.bf16 %v292_v47, %v290_v46  ;;  %v293_v52 = vmax.f32 %v278_v48, 0.0  ;;  %v282_v54 = vadd.f32 %v281_v49, %v106_v29  ;;  %v4256_v46 = vld [vmem:[%s5881_s3 + $0x244] ss:$12 sps:$4 sm:$0xff]   ;;  %v4254_v47 = vld [vmem:[%s5881_s3 + $0x240] ss:$12 sps:$4 sm:$0xff]  }
 0x14d   :  { %v283_v53 = vpop.f32.mrf.mxu0  ;;  %1736 = vmatprep.subr.bf16.mxu0 %v4256_v46 }
 0x14e   :  { %v4805_v57 = vpack.c.bf16 %v293_v52, %v291_v50  ;;  %v284_v58 = vadd.f32 %v283_v53, %v110_v31  ;;  %v305_v60 = vshll.u32 %v4797_v51, 16  ;;  %v303_v0 = vshrl.u32 %v4797_v51, 16  ;;  %v4265_v50 = vld [vmem:[%s5881_s3 + $0x52c] ss:$12 sps:$4 sm:$0xff]  }
 0x14f   :  { %v285_v59 = vpop.f32.mrf.mxu0  ;;  %v294_v3 = vmax.f32 %v282_v54, 0.0  ;;  %1737 = vmatpush2.bf16.msra.mxu0 %v4254_v47  ;;  %v4257_v47 = vld [vmem:[%s5881_s3 + $0x390] ss:$12 sps:$4 sm:$0xff]  }
 0x150   :  { %v286_v63 = vadd.f32 %v285_v59, %v106_v29  ;;  %v307_v2 = vrot.slane %v305_v60, 1  ;;  %v295_v7 = vmax.f32 %v284_v58, 0.0  ;;  %v312_v9 = vshll.u32 %v4805_v57, 16  ;;  %1808 = vmatprep.subr.bf16.mxu0 %v4265_v50  ;;  %v4262_v50 = vld [vmem:[%s5881_s3 + $0x37c] ss:$12 sps:$4 sm:$0xff]  }
 0x151   :  { %v287_v1 = vpop.f32.mrf.mxu0  ;;  %v334_v14 = vrot.slane %v303_v0, 1  ;;  %v335_v19 = vrot.slane %v305_v60, 2  ;;  %v310_v44 = vshrl.u32 %v4805_v57, 16  ;;  %v326_v54 = vrot.slane %v4805_v57, 1 }
 0x152   :  { %v296_v4 = vmax.f32 %v286_v63, 0.0  ;;  %v288_v5 = vadd.f32 %v287_v1, %v110_v31  ;;  %v308_v8 = vor.u32 %v307_v2, %v303_v0  ;;  %v314_v36 = vrot.slane %v312_v9, 1 }
 0x153   :  { %v336_v38 = vor.u32 %v335_v19, %v334_v14  ;;  %v325_v58 = vrot.slane %v4797_v51, 1  ;;  %v337_v60 = vrot.slane %v310_v44, 1  ;;  %v338_v61 = vrot.slane %v312_v9, 2 }
 0x154   :  { %v300_v12 = vpack.c.bf16 %v296_v4, %v294_v3  ;;  %v297_v13 = vmax.f32 %v288_v5, 0.0  ;;  %316 = vrot.lane.b32.xlu0 %v308_v8, %s4483_s1  ;;  %v315_v48 = vor.u32 %v314_v36, %v310_v44 }
 0x155   :  { %v339_v62 = vor.u32 %v338_v61, %v337_v60 }
 0x156   :  { %v4829_v16 = vpack.c.bf16 %v297_v13, %v295_v7  ;;  %v362_v17 = vshll.u32 %v300_v12, 16  ;;  %v371_v18 = vshrl.u32 %v300_v12, 16  ;;  %v389_v53 = vrot.slane %v300_v12, 1 }
 0x158   :  { %v364_v24 = vrot.slane %v362_v17, 1  ;;  %v397_v28 = vrot.slane %v362_v17, 2  ;;  %v367_v29 = vshll.u32 %v4829_v16, 16  ;;  %v396_v30 = vrot.slane %v371_v18, 1 }
 0x159   :  { %v374_v33 = vshrl.u32 %v4829_v16, 16  ;;  %v390_v52 = vrot.slane %v4829_v16, 1 }
 0x15a   :  { %v365_v31 = vsel %vm360_vm2, %v303_v0, %v364_v24  ;;  %v369_v32 = vrot.slane %v367_v29, 1  ;;  %v4855_v37 = vor.u32 %v397_v28, %v396_v30  ;;  %v373_v42 = vor.u32 %v371_v18, %v364_v24  ;;  %v4251_v28 = vld [vmem:[%s5881_s3 + $0x3a8] ss:$12 sps:$4 sm:$0xff]  }
 0x15b   :  { %377 = vrot.lane.b32.xlu1 %v365_v31, %s4483_s1  ;;  %v399_v55 = vrot.slane %v374_v33, 1  ;;  %v400_v56 = vrot.slane %v367_v29, 2 }
 0x15c   :  { %v376_v41 = vor.u32 %v374_v33, %v369_v32  ;;  %v420_v43 = vsel %vm419_vm3, %v336_v38, %v4855_v37  ;;  %v370_v49 = vsel %vm360_vm2, %v310_v44, %v369_v32  ;;  %v4259_v32 = vld [vmem:[%s5881_s3 + $0x394] ss:$12 sps:$4 sm:$0xff]  }
 0x15d   :  { %v4872_v45 = vsel %vm4858_vm6, %v4797_v51, %v420_v43  ;;  %v401_v59 = vor.u32 %v400_v56, %v399_v55 }
 0x15e   :  { %383 = vrot.lane.b32.xlu0 %v376_v41, %s4483_s1 }
 0x15f   :  { %381 = vrot.lane.b32.xlu1 %v373_v42, %s4483_s1 }
 0x162   :  { %318 = vrot.lane.b32.xlu0 %v315_v48, %s4483_s1 }
 0x163   :  { %379 = vrot.lane.b32.xlu1 %v370_v49, %s4483_s1 }
 0x166   :  { %393 = vrot.lane.b32.xlu0 %v390_v52, %s4482_s26 }
 0x167   :  { %391 = vrot.lane.b32.xlu1 %v389_v53, %s4482_s26 }
 0x16a   :  { %329 = vrot.lane.b32.xlu0 %v326_v54, %s4482_s26 }
 0x16b   :  { %327 = vrot.lane.b32.xlu1 %v325_v58, %s4482_s26  ;;  %v4260_v58 = vld [vmem:[%s5881_s3 + $0x378] ss:$12 sps:$4 sm:$0xff]  }
 0x16e   :  { %404 = vrot.lane.b32.xlu0 %v401_v59, %s4484_s0 }
 0x16f   :  { %402 = vrot.lane.b32.xlu1 %v4855_v37, %s4484_s0 }
 0x173   :  { %340 = vrot.lane.b32.xlu1 %v336_v38, %s4484_s0 }
 0x177   :  { %342 = vrot.lane.b32.xlu1 %v339_v62, %s4484_s0  ;;  %v4268_v62 = vld [vmem:[%s5881_s3 + $0x364] ss:$12 sps:$4 sm:$0xff]  }
 0x1c6   :  { %v4901_v63 = vpop.permute.xlu0 %316 }
 0x1cd   :  { %v378_v51 = vpop.permute.xlu1 %377 }
 0x1ce   :  { %v408_v0 = vsel %vm320_vm7, %v4805_v57, %v378_v51 }
 0x1cf   :  { %v421_v1 = vshrl.u32 %v408_v0, 16  ;;  %v424_v2 = vshll.u32 %v408_v0, 16 }
 0x1d0   :  { %v384_v4 = vpop.permute.xlu0 %383 }
 0x1d1   :  { %v382_v3 = vpop.permute.xlu1 %381  ;;  %v423_v6 = vrot.slane %v421_v1, 1  ;;  %v426_v7 = vrot.slane %v424_v2, 2  ;;  %v4263_v2 = vld [vmem:[%s5881_s3 + $0x528] ss:$12 sps:$4 sm:$0xff]  }
 0x1d2   :  { %v410_v5 = vsel %vm320_vm7, %v4829_v16, %v382_v3  ;;  %v386_v10 = vsel %vm320_vm7, %v382_v3, %v384_v4  ;;  %v349_v16 = vsel %vm320_vm7, %v4805_v57, %v4901_v63 }
 0x1d3   :  { %v428_v8 = vshrl.u32 %v410_v5, 16  ;;  %v431_v9 = vshll.u32 %v410_v5, 16  ;;  %v427_v15 = vor.u32 %v426_v7, %v423_v6  ;;  %v445_v20 = vshrl.u32 %v386_v10, 16  ;;  %v4271_v5 = vld [vmem:[%s5881_s3 + $0x514] ss:$12 sps:$4 sm:$0xff]  }
 0x1d4   :  { %v448_v21 = vshll.u32 %v386_v10, 16  ;;  %v319_v33 = vpop.permute.xlu0 %318  ;;  %v4274_v10 = vld [vmem:[%s5881_s3 + $0x34c] ss:$12 sps:$4 sm:$0xff]  }
 0x1d5   :  { %v430_v11 = vrot.slane %v428_v8, 1  ;;  %v433_v12 = vrot.slane %v431_v9, 2  ;;  %v380_v13 = vpop.permute.xlu1 %379  ;;  %v447_v38 = vrot.slane %v445_v20, 1  ;;  %v321_v3 = vsel %vm320_vm7, %v4901_v63, %v319_v33  ;;  %v4266_v9 = vld [vmem:[%s5881_s3 + $0x360] ss:$12 sps:$4 sm:$0xff]  }
 0x1d6   :  { %v385_v14 = vsel %vm320_vm7, %v378_v51, %v380_v13  ;;  %v450_v40 = vrot.slane %v448_v21, 2  ;;  %v4280_v20 = vld [vmem:[%s5881_s3 + $0x334] ss:$12 sps:$4 sm:$0xff]   ;;  %v4275_v21 = vld [vmem:[%s5881_s3 + $0x4f8] ss:$12 sps:$4 sm:$0xff]  }
 0x1d7   :  { %v4909_v17 = vor.u32 %v433_v12, %v430_v11  ;;  %v437_v18 = vshrl.u32 %v385_v14, 16  ;;  %v440_v19 = vshll.u32 %v385_v14, 16 }
 0x1d8   :  { %v4943_v53 = vor.u32 %v450_v40, %v447_v38  ;;  %v4947_v55 = vpop.permute.xlu0 %393  ;;  %v4298_v38 = vld [vmem:[%s5881_s3 + $0x46c] ss:$12 sps:$4 sm:$0xff]   ;;  %v4293_v40 = vld [vmem:[%s5881_s3 + $0x4b0] ss:$12 sps:$4 sm:$0xff]  }
 0x1d9   :  { %v439_v22 = vrot.slane %v437_v18, 1  ;;  %v4914_v23 = vpop.permute.xlu1 %391  ;;  %v435_v24 = vsel %vm419_vm3, %v427_v15, %v4909_v17  ;;  %v442_v29 = vrot.slane %v440_v19, 2  ;;  %v4277_v15 = vld [vmem:[%s5881_s3 + $0x4fc] ss:$12 sps:$4 sm:$0xff]  }
 0x1da   :  { %v413_v30 = vsel %vm50_vm1, %v380_v13, %v4914_v23  ;;  %v415_v31 = vsel %vm50_vm1, %v384_v4, %v4914_v23  ;;  %v4927_v57 = vsel %vm4858_vm6, %v349_v16, %v435_v24  ;;  %v4269_v13 = vld [vmem:[%s5881_s3 + $0x510] ss:$12 sps:$4 sm:$0xff]   ;;  %v4272_v19 = vld [vmem:[%s5881_s3 + $0x348] ss:$12 sps:$4 sm:$0xff]  }
 0x1db   :  { %v453_v34 = vshrl.u32 %v413_v30, 16  ;;  %v456_v35 = vshll.u32 %v413_v30, 16  ;;  %v460_v36 = vshrl.u32 %v415_v31, 16  ;;  %1687 = vmatprep.mubr.bf16.mxu1 %v4927_v57  ;;  %v463_v41 = vshll.u32 %v415_v31, 16  ;;  %v4283_v16 = vld [vmem:[%s5881_s3 + $0x4e4] ss:$12 sps:$4 sm:$0xff]  }
 0x1dc   :  { %1688 = vmatmul.mubr.bf16.vlgmr.msra.gmra.mxu1 %v4872_v45  ;;  %v443_v48 = vor.u32 %v442_v29, %v439_v22  ;;  %v4993_v11 = vpop.permute.xlu0 %329  ;;  %v4278_v22 = vld [vmem:[%s5881_s3 + $0x330] ss:$12 sps:$4 sm:$0xff]   ;;  %v4485_v29 = vmov 0   ;;  %v4289_v30 = vld [vmem:[%s5881_s3 + $0x4cc] ss:$12 sps:$4 sm:$0xff]  }
 0x1dd   :  { %v455_v42 = vrot.slane %v453_v34, 1  ;;  %v458_v43 = vrot.slane %v456_v35, 2  ;;  %v462_v44 = vrot.slane %v460_v36, 1  ;;  %1758 = vmatpush1.bf16.msra.mxu1 %v4251_v28  ;;  %v4934_v46 = vpop.permute.xlu1 %327  ;;  %1697 = vmatprep.mubr.bf16.mxu1 %v4909_v17  ;;  %v465_v49 = vrot.slane %v463_v41, 2  ;;  %v4286_v24 = vld [vmem:[%s5881_s3 + $0x31c] ss:$12 sps:$4 sm:$0xff]  }
 0x1de   :  { %1759 = vmatprep.subr.bf16.mxu1 %v4259_v32  ;;  %v452_v61 = vsel %vm419_vm3, %v443_v48, %v4943_v53  ;;  %v353_v51 = vsel %vm50_vm1, %v319_v33, %v4934_v46  ;;  %v4281_v28 = vld [vmem:[%s5881_s3 + $0x4e0] ss:$12 sps:$4 sm:$0xff]   ;;  %v4284_v31 = vld [vmem:[%s5881_s3 + $0x318] ss:$12 sps:$4 sm:$0xff]   ;;  %v4287_v33 = vld [vmem:[%s5881_s3 + $0x4c8] ss:$12 sps:$4 sm:$0xff]  }
 0x1df   :  { %v459_v52 = vor.u32 %v458_v43, %v455_v42  ;;  %v4945_v54 = vor.u32 %v465_v49, %v462_v44  ;;  %v4982_v8 = vsel %vm4858_vm6, %v321_v3, %v452_v61  ;;  %v4292_v32 = vld [vmem:[%s5881_s3 + $0x304] ss:$12 sps:$4 sm:$0xff]   ;;  %v4295_v34 = vld [vmem:[%s5881_s3 + $0x4b4] ss:$12 sps:$4 sm:$0xff]   ;;  %v4301_v42 = vld [vmem:[%s5881_s3 + $0x49c] ss:$12 sps:$4 sm:$0xff]  }
 0x1e0   :  { %v405_v35 = vpop.permute.xlu0 %404  ;;  %v4290_v36 = vld [vmem:[%s5881_s3 + $0x300] ss:$12 sps:$4 sm:$0xff]   ;;  %v4296_v43 = vld [vmem:[%s5881_s3 + $0x468] ss:$12 sps:$4 sm:$0xff]   ;;  %v4299_v49 = vld [vmem:[%s5881_s3 + $0x498] ss:$12 sps:$4 sm:$0xff]  }
 0x1e1   :  { %1760 = vmatpush1.bf16.msra.mxu1 %v4257_v47  ;;  %v4949_v56 = vpop.permute.xlu1 %402  ;;  %v467_v60 = vsel %vm419_vm3, %v459_v52, %v4945_v54  ;;  %v4304_v44 = vld [vmem:[%s5881_s3 + $0x454] ss:$12 sps:$4 sm:$0xff]   ;;  %v4302_v52 = vld [vmem:[%s5881_s3 + $0x450] ss:$12 sps:$4 sm:$0xff]  }
 0x1e2   :  { %v418_v59 = vsel %vm344_vm8, %v4947_v55, %v4949_v56  ;;  %1761 = vmatprep.subr.bf16.mxu1 %v4262_v50  ;;  %v4973_v4 = vsel %vm4858_vm6, %v353_v51, %v467_v60  ;;  %v406_v41 = vsel %vm344_vm8, %v4949_v56, %v405_v35  ;;  %v4307_v50 = vld [vmem:[%s5881_s3 + $0x484] ss:$12 sps:$4 sm:$0xff]   ;;  %v4310_v56 = vld [vmem:[%s5881_s3 + $0x43c] ss:$12 sps:$4 sm:$0xff]   ;;  %v4305_v61 = vld [vmem:[%s5881_s3 + $0x480] ss:$12 sps:$4 sm:$0xff]  }
 0x1e3   :  { %v477_v0 = vshrl.u32 %v418_v59, 16  ;;  %v480_v1 = vshll.u32 %v418_v59, 16  ;;  %1738 = vmatprep.mubr.bf16.mxu0 %v4973_v4  ;;  %v486_v47 = vshrl.u32 %v406_v41, 16  ;;  %v489_v48 = vshll.u32 %v406_v41, 16  ;;  %v4308_v51 = vld [vmem:[%s5881_s3 + $0x438] ss:$12 sps:$4 sm:$0xff]  }
 0x1e4   :  { %1698 = vmatmul.mubr.bf16.gmra.mxu1 %v4855_v37  ;;  %1739 = vmatmul.mubr.bf16.vlgmr.msra.gmra.mxu0 %v4982_v8  ;;  %v4312_v3 = vld [vmem:[%s5881_s3 + $0x230] ss:$12 sps:$4 sm:$0xff]  }
 0x1e5   :  { %v479_v6 = vrot.slane %v477_v0, 1  ;;  %v482_v7 = vrot.slane %v480_v1, 2  ;;  %1762 = vmatpush1.bf16.msra.mxu1 %v4260_v58  ;;  %v4984_v63 = vpop.permute.xlu1 %340  ;;  %1809 = vmatpush1.bf16.msra.mxu0 %v4263_v2  ;;  %v488_v58 = vrot.slane %v486_v47, 1  ;;  %v491_v59 = vrot.slane %v489_v48, 2  ;;  %v4315_v1 = vld [vmem:[%s5881_s3 + $0x424] ss:$12 sps:$4 sm:$0xff]  }
 0x1e6   :  { %1763 = vmatprep.subr.bf16.mxu1 %v4268_v62  ;;  %1748 = vmatprep.mubr.bf16.mxu0 %v4945_v54  ;;  %v358_v14 = vsel %vm344_vm8, %v4993_v11, %v4984_v63  ;;  %v4311_v62 = vld [vmem:[%s5881_s3 + $0x2f0] ss:$12 sps:$4 sm:$0xff]   ;;  %v4341_v47 = vld [vmem:[%s5881_s3 + $0x1a0] ss:$12 sps:$4 sm:$0xff]   ;;  %v4345_v48 = vld [vmem:[%s5881_s3 + $0x188] ss:$12 sps:$4 sm:$0xff]  }
 0x1e7   :  { %v4995_v12 = vor.u32 %v482_v7, %v479_v6  ;;  %1810 = vmatprep.subr.bf16.mxu0 %v4271_v5  ;;  %v5097_v2 = vor.u32 %v491_v59, %v488_v58  ;;  %v4316_v5 = vld [vmem:[%s5881_s3 + $0x2d8] ss:$12 sps:$4 sm:$0xff]   ;;  %v4313_v7 = vld [vmem:[%s5881_s3 + $0x420] ss:$12 sps:$4 sm:$0xff]   ;;  %v4338_v35 = vld [vmem:[%s5881_s3 + $0x170] ss:$12 sps:$4 sm:$0xff]  }
 0x1e8   :  { %v4340_v41 = vld [vmem:[%s5881_s3 + $0xb0] ss:$12 sps:$4 sm:$0xff]   ;;  %v4351_v58 = vld [vmem:[%s5881_s3 + $0x68] ss:$12 sps:$4 sm:$0xff]  }
 0x1e9   :  { %1764 = vmatpush1.bf16.msra.mxu1 %v4266_v9  ;;  %v5010_v18 = vsel %vm4858_vm6, %v358_v14, %v4995_v12  ;;  %1811 = vmatpush1.bf16.msra.mxu0 %v4269_v13  ;;  %v343_v60 = vpop.permute.xlu1 %342  ;;  %v4317_v9 = vld [vmem:[%s5881_s3 + $0x218] ss:$12 sps:$4 sm:$0xff]   ;;  %v4318_v13 = vld [vmem:[%s5881_s3 + $0x408] ss:$12 sps:$4 sm:$0xff]   ;;  %v4352_v59 = vld [vmem:[%s5881_s3 + $0x110] ss:$12 sps:$4 sm:$0xff]  }
 0x1ea   :  { %1789 = vmatprep.mubr.bf16.mxu1 %v5010_v18  ;;  %1765 = vmatprep.subr.bf16.mxu1 %v4274_v10  ;;  %v345_v0 = vsel %vm344_vm8, %v4984_v63, %v343_v60  ;;  %v4320_v63 = vld [vmem:[%s5881_s3 + $0x40c] ss:$12 sps:$4 sm:$0xff]   ;;  %v4325_v14 = vld [vmem:[%s5881_s3 + $0x3f4] ss:$12 sps:$4 sm:$0xff]  }
 0x1eb   :  { %1812 = vmatprep.subr.bf16.mxu0 %v4277_v15  ;;  %v5108_v6 = vsel %vm4858_vm6, %v345_v0, %v5097_v2  ;;  %v4321_v10 = vld [vmem:[%s5881_s3 + $0x2c0] ss:$12 sps:$4 sm:$0xff]  }
 0x1ec   :  { %1749 = vmatmul.mubr.bf16.gmra.mxu0 %v4943_v53  ;;  %v4322_v15 = vld [vmem:[%s5881_s3 + $0x200] ss:$12 sps:$4 sm:$0xff]  }
 0x1ed   :  { %1766 = vmatpush1.bf16.msra.mxu1 %v4272_v19  ;;  %1813 = vmatpush1.bf16.msra.mxu0 %v4275_v21  ;;  %v395_v19 = vsel %vm50_vm1, %v4914_v23, %v4947_v55  ;;  %v4323_v21 = vld [vmem:[%s5881_s3 + $0x3f0] ss:$12 sps:$4 sm:$0xff]   ;;  %v4327_v23 = vld [vmem:[%s5881_s3 + $0x1e8] ss:$12 sps:$4 sm:$0xff]   ;;  %v4353_v60 = vld [vmem:[%s5881_s3 + $0x500] ss:$12 sps:$4 sm:$0xff]  }
 0x1ee   :  { %1767 = vmatprep.subr.bf16.mxu1 %v4280_v20  ;;  %1840 = vmatprep.mubr.bf16.mxu0 %v4485_v29  ;;  %v4326_v20 = vld [vmem:[%s5881_s3 + $0x2a8] ss:$12 sps:$4 sm:$0xff]   ;;  %v4331_v55 = vld [vmem:[%s5881_s3 + $0x290] ss:$12 sps:$4 sm:$0xff]   ;;  %v4360_v0 = vld [vmem:[%s5881_s3 + $0x20] ss:$12 sps:$4 sm:$0xff]  }
 0x1ef   :  { %1814 = vmatprep.subr.bf16.mxu0 %v4283_v16  ;;  %v4330_v16 = vld [vmem:[%s5881_s3 + $0x3dc] ss:$12 sps:$4 sm:$0xff]  }
 0x1f1   :  { %1768 = vmatpush1.bf16.msra.mxu1 %v4278_v22  ;;  %1815 = vmatpush1.bf16.msra.mxu0 %v4281_v28  ;;  %v469_v22 = vshrl.u32 %v395_v19, 16  ;;  %v4328_v28 = vld [vmem:[%s5881_s3 + $0x3d8] ss:$12 sps:$4 sm:$0xff]  }
 0x1f2   :  { %1769 = vmatprep.subr.bf16.mxu1 %v4286_v24  ;;  %1816 = vmatprep.subr.bf16.mxu0 %v4289_v30  ;;  %v472_v24 = vshll.u32 %v395_v19, 16  ;;  %v4335_v30 = vld [vmem:[%s5881_s3 + $0x3c4] ss:$12 sps:$4 sm:$0xff]  }
 0x1f3   :  { %v4375_v19 = vld [vmem:[%s5881_s3 + $0x350] ss:$12 sps:$4 sm:$0xff]  }
 0x1f5   :  { %1770 = vmatpush1.bf16.msra.mxu1 %v4284_v31  ;;  %1817 = vmatpush1.bf16.msra.mxu0 %v4287_v33  ;;  %v474_v31 = vrot.slane %v472_v24, 2  ;;  %v4336_v33 = vld [vmem:[%s5881_s3 + $0x278] ss:$12 sps:$4 sm:$0xff]  }
 0x1f6   :  { %1771 = vmatprep.subr.bf16.mxu1 %v4292_v32  ;;  %1818 = vmatprep.subr.bf16.mxu0 %v4295_v34  ;;  %v4332_v32 = vld [vmem:[%s5881_s3 + $0x1d0] ss:$12 sps:$4 sm:$0xff]   ;;  %v4333_v34 = vld [vmem:[%s5881_s3 + $0x3c0] ss:$12 sps:$4 sm:$0xff]  }
 0x1f7   :  { %v4383_v24 = vld [vmem:[%s5883_s5 + $0x38] sm:$0xff]  }
 0x1f9   :  { %1772 = vmatpush1.bf16.msra.mxu1 %v4290_v36  ;;  %1819 = vmatpush1.bf16.msra.mxu0 %v4293_v40  ;;  %v4339_v40 = vld [vmem:[%s5881_s3 + $0x260] ss:$12 sps:$4 sm:$0xff]  }
 0x1fa   :  { %1773 = vmatprep.subr.bf16.mxu1 %v4298_v38  ;;  %1820 = vmatprep.subr.bf16.mxu0 %v4301_v42  ;;  %v4337_v38 = vld [vmem:[%s5881_s3 + $0x1b8] ss:$12 sps:$4 sm:$0xff]   ;;  %v332_v42 = vsel %vm50_vm1, %v4934_v46, %v4993_v11  ;;  %v4343_v46 = vld [vmem:[%s5881_s3 + $0x248] ss:$12 sps:$4 sm:$0xff]   ;;  %v4346_v11 = vld [vmem:[%s5881_s3 + $0x140] ss:$12 sps:$4 sm:$0xff]  }
 0x1fd   :  { %1774 = vmatpush2.bf16.msra.mxu1 %v4296_v43  ;;  %1821 = vmatpush1.bf16.msra.mxu0 %v4299_v49  ;;  %v4342_v43 = vld [vmem:[%s5881_s3 + $0x158] ss:$12 sps:$4 sm:$0xff]   ;;  %v4347_v49 = vld [vmem:[%s5881_s3 + $0x530] ss:$12 sps:$4 sm:$0xff]  }
 0x1fe   :  { %1775 = vmatprep.subr.bf16.mxu1 %v4304_v44  ;;  %1822 = vmatprep.subr.bf16.mxu0 %v4307_v50  ;;  %v4348_v50 = vld [vmem:[%s5881_s3 + $0x80] ss:$12 sps:$4 sm:$0xff]  }
 0x201   :  { %1776 = vmatpush2.bf16.msra.mxu1 %v4302_v52  ;;  %1823 = vmatpush1.bf16.msra.mxu0 %v4305_v61  ;;  %v4349_v52 = vld [vmem:[%s5881_s3 + $0x128] ss:$12 sps:$4 sm:$0xff]   ;;  %v4357_v61 = vld [vmem:[%s5881_s3 + $0x38] ss:$12 sps:$4 sm:$0xff]  }
 0x202   :  { %1777 = vmatprep.subr.bf16.mxu1 %v4310_v56  ;;  %3891 = vmatprep.subr.bf16.mxu0 %v4311_v62  ;;  %v4350_v56 = vld [vmem:[%s5881_s3 + $0x518] ss:$12 sps:$4 sm:$0xff]   ;;  %v4358_v62 = vld [vmem:[%s5881_s3 + $0xe0] ss:$12 sps:$4 sm:$0xff]  }
 0x204   :  { %1841 = vmatmul.mubr.bf16.vlgmr.msra.gmra.mxu0 %v5108_v6 }
 0x205   :  { %1778 = vmatpush2.bf16.msra.mxu1 %v4308_v51  ;;  %3892 = vmatpush3.bf16.msra.mxu0 %v4312_v3  ;;  %v4359_v51 = vld [vmem:[%s5881_s3 + $0x4d0] ss:$12 sps:$4 sm:$0xff]   ;;  %v4363_v3 = vld [vmem:[%s5881_s3 + $0x8] ss:$12 sps:$4 sm:$0xff]  }
 0x206   :  { %1779 = vmatprep.subr.bf16.mxu1 %v4315_v1  ;;  %1850 = vmatprep.mubr.bf16.mxu0 %v4485_v29  ;;  %v4362_v1 = vld [vmem:[%s5881_s3 + $0x4b8] ss:$12 sps:$4 sm:$0xff]  }
 0x207   :  { %3893 = vmatprep.subr.bf16.mxu0 %v4316_v5  ;;  %v4364_v5 = vld [vmem:[%s5881_s3 + $0x470] ss:$12 sps:$4 sm:$0xff]  }
 0x209   :  { %1780 = vmatpush2.bf16.msra.mxu1 %v4313_v7  ;;  %3894 = vmatpush3.bf16.msra.mxu0 %v4317_v9  ;;  %v4366_v7 = vld [vmem:[%s5881_s3 + $0x3b0] ss:$12 sps:$4 sm:$0xff]   ;;  %v4368_v9 = vld [vmem:[%s5881_s3 + $0x488] ss:$12 sps:$4 sm:$0xff]  }
 0x20a   :  { %1781 = vmatprep.subr.bf16.mxu1 %v4320_v63  ;;  %3895 = vmatprep.subr.bf16.mxu0 %v4321_v10  ;;  %v4367_v63 = vld [vmem:[%s5881_s3 + $0x458] ss:$12 sps:$4 sm:$0xff]  }
 0x20b   :  { %v4369_v10 = vld [vmem:[%s5881_s3 + $0x398] ss:$12 sps:$4 sm:$0xff]  }
 0x20c   :  { %1851 = vmatmul.mubr.bf16.gmra.mxu0 %v5097_v2 }
 0x20d   :  { %1782 = vmatpush2.bf16.msra.mxu1 %v4318_v13  ;;  %3896 = vmatpush3.bf16.msra.mxu0 %v4322_v15  ;;  %v4370_v13 = vld [vmem:[%s5881_s3 + $0x440] ss:$12 sps:$4 sm:$0xff]   ;;  %v4374_v15 = vld [vmem:[%s5881_s3 + $0x410] ss:$12 sps:$4 sm:$0xff]  }
 0x20e   :  { %1783 = vmatprep.subr.bf16.mxu1 %v4325_v14  ;;  %1939 = vmatprep.mubr.bf16.mxu0 %v4973_v4  ;;  %v471_v4 = vrot.slane %v469_v22, 1  ;;  %v4373_v14 = vld [vmem:[%s5881_s3 + $0x368] ss:$12 sps:$4 sm:$0xff]   ;;  %v4382_v22 = vld [vmem:[%s5883_s5 + $0x78] sm:$0xff]  }
 0x20f   :  { %3897 = vmatprep.subr.bf16.mxu0 %v4326_v20  ;;  %v4379_v20 = vld [vmem:[%s5881_s3 + $0x320] ss:$12 sps:$4 sm:$0xff]  }
 0x210   :  { %v5171_v36 = vor.u32 %v474_v31, %v471_v4  ;;  %v4389_v4 = vld [vmem:[%s5883_s5 + $0x20] sm:$0xff]   ;;  %v4390_v31 = vld [vmem:[%s5883_s5 + $0x58] sm:$0xff]  }
 0x211   :  { %1784 = vmatpush2.bf16.msra.mxu1 %v4323_v21  ;;  %3898 = vmatpush3.bf16.msra.mxu0 %v4327_v23  ;;  %v4380_v21 = vld [vmem:[%s5881_s3 + $0x3c8] ss:$12 sps:$4 sm:$0xff]  }
 0x212   :  { %1785 = vmatprep.subr.bf16.mxu1 %v4330_v16  ;;  %3899 = vmatprep.subr.bf16.mxu0 %v4331_v55  ;;  %v5191_v44 = vsel %vm4858_vm6, %v332_v42, %v5171_v36  ;;  %v4381_v16 = vld [vmem:[%s5881_s3 + $0x308] ss:$12 sps:$4 sm:$0xff]  }
 0x213   :  { %v4384_v23 = vld [vmem:[%s5883_s5 + $0x70] sm:$0xff]  }
 0x214   :  { %v4385_v55 = vld [vmem:[%s5883_s5 + $0x30] sm:$0xff]  }
 0x215   :  { %1786 = vmatpush2.bf16.msra.mxu1 %v4328_v28  ;;  %3900 = vmatpush3.bf16.msra.mxu0 %v4332_v32  ;;  %v4386_v28 = vld [vmem:[%s5883_s5 + $0x68] sm:$0xff]   ;;  %v4391_v32 = vld [vmem:[%s5883_s5 + $0x18] sm:$0xff]  }
 0x216   :  { %1787 = vmatprep.subr.bf16.mxu1 %v4335_v30  ;;  %3901 = vmatprep.subr.bf16.mxu0 %v4336_v33  ;;  %v4387_v30 = vld [vmem:[%s5883_s5 + $0x28] sm:$0xff]   ;;  %v4392_v33 = vld [vmem:[%s5883_s5 + $0x50] sm:$0xff]  }
 0x219   :  { %1788 = vmatpush2.bf16.msra.mxu1 %v4333_v34  ;;  %3902 = vmatpush3.bf16.msra.mxu0 %v4337_v38  ;;  %v4393_v34 = vld [vmem:[%s5883_s5 + $0x10] sm:$0xff]   ;;  %v4396_v38 = vld [vmem:[%s5883_s5 + $0x40] sm:$0xff]  }
 0x21a   :  { %3863 = vmatprep.subr.bf16.mxu1 %v4338_v35  ;;  %3903 = vmatprep.subr.bf16.mxu0 %v4339_v40  ;;  %v4394_v35 = vld [vmem:[%s5883_s5 + $0x48] sm:$0xff]   ;;  %v4397_v40 = vld [vmem:[%s5883_s5] sm:$0xff]  }
 0x21c   :  { %1790 = vmatmul.mubr.bf16.vlgmr.msra.gmra.mxu1 %v5191_v44 }
 0x21d   :  { %1799 = vmatprep.mubr.bf16.mxu1 %v4995_v12  ;;  %3864 = vmatpush3.bf16.msra.mxu1 %v4340_v41 }
 0x21e   :  { %3865 = vmatprep.subr.bf16.mxu1 %v4342_v43  ;;  %3904 = vmatpush3.bf16.msra.mxu0 %v4341_v47 }
 0x21f   :  { %3905 = vmatprep.subr.bf16.mxu0 %v4343_v46 }
 0x221   :  { %3866 = vmatpush3.bf16.msra.mxu1 %v4344_v39 }
 0x222   :  { %3867 = vmatprep.subr.bf16.mxu1 %v4346_v11  ;;  %3906 = vmatpush3.bf16.msra.mxu0 %v4345_v48 }
 0x223   :  { %4076 = vmatprep.subr.bf16.mxu0 %v4347_v49 }
 0x224   :  { %1800 = vmatmul.mubr.bf16.gmra.mxu1 %v5171_v36 }
 0x225   :  { %3868 = vmatpush3.bf16.msra.mxu1 %v4348_v50  ;;  %1891 = vmatprep.mubr.bf16.mxu1 %v4927_v57  ;;  %v4354_v57 = vld [vmem:[%s5881_s3 + $0x50] ss:$12 sps:$4 sm:$0xff]  }
 0x226   :  { %1940 = vmatmul.mubr.bf16.vlgmr.msra.gmra.mxu0 %v4982_v8  ;;  %3869 = vmatprep.subr.bf16.mxu1 %v4349_v52  ;;  %v4355_v8 = vld [vmem:[%s5881_s3 + $0xf8] ss:$12 sps:$4 sm:$0xff]  }
 0x227   :  { %1947 = vmatprep.mubr.bf16.mxu0 %v4945_v54  ;;  %4077 = vmatpush3.bf16.msra.mxu0 %v4347_v49  ;;  %v4356_v54 = vld [vmem:[%s5881_s3 + $0x4e8] ss:$12 sps:$4 sm:$0xff]  }
 0x228   :  { %4078 = vmatprep.subr.bf16.mxu0 %v4350_v56 }
 0x229   :  { %3870 = vmatpush3.bf16.msra.mxu1 %v4351_v58 }
 0x22a   :  { %3871 = vmatprep.subr.bf16.mxu1 %v4352_v59 }
 0x22b   :  { %4079 = vmatpush3.bf16.msra.mxu0 %v4350_v56 }
 0x22c   :  { %4080 = vmatprep.subr.bf16.mxu0 %v4353_v60 }
 0x22d   :  { %3872 = vmatpush3.bf16.msra.mxu1 %v4354_v57 }
 0x22e   :  { %1948 = vmatmul.mubr.bf16.gmra.mxu0 %v4943_v53  ;;  %3873 = vmatprep.subr.bf16.mxu1 %v4355_v8  ;;  %v4361_v53 = vld [vmem:[%s5881_s3 + $0xc8] ss:$12 sps:$4 sm:$0xff]  }
 0x22f   :  { %4081 = vmatpush3.bf16.msra.mxu0 %v4353_v60  ;;  %4092 = vmatprep.mubr.bf16.mxu0 %v5108_v6  ;;  %v4365_v6 = vld [vmem:[%s5881_s3 + $0x4a0] ss:$12 sps:$4 sm:$0xff]  }
 0x230   :  { %4082 = vmatprep.subr.bf16.mxu0 %v4356_v54 }
 0x231   :  { %3874 = vmatpush3.bf16.msra.mxu1 %v4357_v61 }
 0x232   :  { %3875 = vmatprep.subr.bf16.mxu1 %v4358_v62 }
 0x233   :  { %4083 = vmatpush3.bf16.msra.mxu0 %v4356_v54 }
 0x234   :  { %4084 = vmatprep.subr.bf16.mxu0 %v4359_v51 }
 0x235   :  { %3876 = vmatpush3.bf16.msra.mxu1 %v4360_v0  ;;  %v5382_v0 = vld [vmem:[%s5884_s4] sm:$0x7] }
 0x236   :  { %3877 = vmatprep.subr.bf16.mxu1 %v4361_v53 }
 0x237   :  { %4085 = vmatpush3.bf16.msra.mxu0 %v4359_v51 }
 0x238   :  { %4086 = vmatprep.subr.bf16.mxu0 %v4362_v1 }
 0x239   :  { %3878 = vmatpush3.bf16.msra.mxu1 %v4363_v3  ;;  %v4398_v3 = vld [vmem:[%s5883_s5 + $0xf8] sm:$0xff]  }
 0x23a   :  { %3919 = vmatprep.subr.bf16.mxu1 %v4364_v5  ;;  %v4399_v5 = vld [vmem:[%s5883_s5 + $0xb8] sm:$0xff]  }
 0x23b   :  { %4087 = vmatpush3.bf16.msra.mxu0 %v4362_v1 }
 0x23c   :  { %1892 = vmatmul.mubr.bf16.vlgmr.msra.gmra.mxu1 %v4872_v45  ;;  %4088 = vmatprep.subr.bf16.mxu0 %v4365_v6  ;;  %v4371_v45 = vld [vmem:[%s5881_s3 + $0x380] ss:$12 sps:$4 sm:$0xff]  }
 0x23d   :  { %1899 = vmatprep.mubr.bf16.mxu1 %v4909_v17  ;;  %3920 = vmatpush3.bf16.msra.mxu1 %v4366_v7  ;;  %v4372_v17 = vld [vmem:[%s5881_s3 + $0x428] ss:$12 sps:$4 sm:$0xff]  }
 0x23e   :  { %3921 = vmatprep.subr.bf16.mxu1 %v4367_v63  ;;  %v4400_v7 = vld [vmem:[%s5883_s5 + $0xf0] sm:$0xff]   ;;  %v751_v63 = vrot.slane %v5382_v0, %v109_v27  ;;  %v4404_v27 = vld [vmem:[%s5883_s5 + $0xe0] sm:$0xff]  }
 0x23f   :  { %4089 = vmatpush3.bf16.msra.mxu0 %v4365_v6  ;;  %v747_v6 = vrot.slane %v5382_v0, %v105_v26 }
 0x240   :  { %4090 = vmatprep.subr.bf16.mxu0 %v4368_v9 }
 0x241   :  { %3922 = vmatpush3.bf16.msra.mxu1 %v4369_v10  ;;  %v4402_v10 = vld [vmem:[%s5883_s5 + $0xe8] sm:$0xff]  }
 0x242   :  { %3923 = vmatprep.subr.bf16.mxu1 %v4370_v13 }
 0x243   :  { %4091 = vmatpush3.bf16.msra.mxu0 %v4368_v9  ;;  %v4401_v9 = vld [vmem:[%s5883_s5 + $0xb0] sm:$0xff]  }
 0x244   :  { %1900 = vmatmul.mubr.bf16.gmra.mxu1 %v4855_v37  ;;  %v4376_v37 = vld [vmem:[%s5881_s3 + $0x3f8] ss:$12 sps:$4 sm:$0xff]   ;;  %3979 = vmatprep.subr.bf16.mxu0 %v4398_v3 }
 0x245   :  { %3924 = vmatpush3.bf16.msra.mxu1 %v4371_v45  ;;  %1987 = vmatprep.mubr.bf16.mxu1 %v5010_v18  ;;  %v4377_v18 = vld [vmem:[%s5881_s3 + $0x338] ss:$12 sps:$4 sm:$0xff]  }
 0x246   :  { %4093 = vmatmul.mubr.bf16.vlgmr.msra.gmra.mxu0 %v5097_v2  ;;  %3925 = vmatprep.subr.bf16.mxu1 %v4372_v17  ;;  %v4378_v2 = vld [vmem:[%s5881_s3 + $0x3e0] ss:$12 sps:$4 sm:$0xff]  }
 0x247   :  { %3980 = vmatpush3.bf16.msra.mxu0 %v4399_v5  ;;  %v4403_v17 = vld [vmem:[%s5883_s5 + $0xa8] sm:$0xff]  }
 0x248   :  { %3981 = vmatprep.subr.bf16.mxu0 %v4400_v7 }
 0x249   :  { %3926 = vmatpush3.bf16.msra.mxu1 %v4373_v14 }
 0x24a   :  { %3927 = vmatprep.subr.bf16.mxu1 %v4374_v15 }
 0x24b   :  { %3982 = vmatpush3.bf16.msra.mxu0 %v4401_v9 }
 0x24c   :  { %3983 = vmatprep.subr.bf16.mxu0 %v4402_v10 }
 0x24d   :  { %3928 = vmatpush3.bf16.msra.mxu1 %v4375_v19 }
 0x24e   :  { %3929 = vmatprep.subr.bf16.mxu1 %v4376_v37 }
 0x24f   :  { %3984 = vmatpush3.bf16.msra.mxu0 %v4403_v17 }
 0x250   :  { %3985 = vmatprep.subr.bf16.mxu0 %v4404_v27 }
 0x251   :  { %3930 = vmatpush3.bf16.msra.mxu1 %v4377_v18 }
 0x252   :  { %3931 = vmatprep.subr.bf16.mxu1 %v4378_v2 }
 0x255   :  { %3932 = vmatpush3.bf16.msra.mxu1 %v4379_v20 }
 0x256   :  { %3933 = vmatprep.subr.bf16.mxu1 %v4380_v21 }
 0x259   :  { %3934 = vmatpush3.bf16.msra.mxu1 %v4381_v16  ;;  %v4405_v16 = vld [vmem:[%s5883_s5 + $0xa0] sm:$0xff]  }
 0x25a   :  { %3957 = vmatprep.subr.bf16.mxu1 %v4382_v22  ;;  %3986 = vmatpush3.bf16.msra.mxu0 %v4405_v16  ;;  %v4411_v16 = vld [vmem:[%s5883_s5 + $0x88] sm:$0xff]  }
 0x25c   :  { %1988 = vmatmul.mubr.bf16.vlgmr.msra.gmra.mxu1 %v5191_v44 }
 0x25d   :  { %1995 = vmatprep.mubr.bf16.mxu1 %v4995_v12  ;;  %3958 = vmatpush3.bf16.msra.mxu1 %v4383_v24  ;;  %v4388_v12 = vld [vmem:[%s5883_s5 + $0x60] sm:$0xff]  }
 0x25e   :  { %3959 = vmatprep.subr.bf16.mxu1 %v4384_v23 }
 0x261   :  { %3960 = vmatpush3.bf16.msra.mxu1 %v4385_v55 }
 0x262   :  { %3961 = vmatprep.subr.bf16.mxu1 %v4386_v28 }
 0x264   :  { %1996 = vmatmul.mubr.bf16.gmra.mxu1 %v5171_v36  ;;  %v4395_v36 = vld [vmem:[%s5883_s5 + $0x8] sm:$0xff]  }
 0x265   :  { %3962 = vmatpush3.bf16.msra.mxu1 %v4387_v30 }
 0x266   :  { %3963 = vmatprep.subr.bf16.mxu1 %v4388_v12 }
 0x269   :  { %3964 = vmatpush3.bf16.msra.mxu1 %v4389_v4 }
 0x26a   :  { %3965 = vmatprep.subr.bf16.mxu1 %v4390_v31 }
 0x26d   :  { %3966 = vmatpush3.bf16.msra.mxu1 %v4391_v32 }
 0x26e   :  { %3967 = vmatprep.subr.bf16.mxu1 %v4392_v33 }
 0x271   :  { %3968 = vmatpush3.bf16.msra.mxu1 %v4393_v34 }
 0x272   :  { %3969 = vmatprep.subr.bf16.mxu1 %v4394_v35 }
 0x275   :  { %3970 = vmatpush3.bf16.msra.mxu1 %v4395_v36 }
 0x276   :  { %3971 = vmatprep.subr.bf16.mxu1 %v4396_v38 }
 0x279   :  { %3972 = vmatpush3.bf16.msra.mxu1 %v4397_v40 }
 0x29c   :  { %v1689_v41 = vpop.f32.mrf.mxu1 }
 0x29d   :  { %v1690_v26 = vadd.f32 %v1689_v41, %v747_v6 }
 0x29e   :  { %v1691_v42 = vpop.f32.mrf.mxu1 }
 0x29f   :  { %v1692_v13 = vadd.f32 %v1691_v42, %v751_v63 }
 0x2a0   :  { %v1693_v43 = vpop.f32.mrf.mxu1 }
 0x2a1   :  { %v1694_v15 = vadd.f32 %v1693_v43, %v747_v6 }
 0x2a2   :  { %v1695_v44 = vpop.f32.mrf.mxu1 }
 0x2a3   :  { %v1696_v2 = vadd.f32 %v1695_v44, %v751_v63 }
 0x2a4   :  { %v1699_v47 = vpop.f32.mrf.mxu1  ;;  %v1740_v46 = vpop.f32.mrf.mxu0 }
 0x2a5   :  { %v1741_v45 = vadd.f32 %v1740_v46, %v1690_v26  ;;  %v1700_v24 = vadd.f32 %v1699_v47, %v747_v6  ;;  %v4409_v6 = vld [vmem:[%s5883_s5 + $0x90] sm:$0xff]  }
 0x2a6   :  { %v1701_v39 = vpop.f32.mrf.mxu1  ;;  %v1742_v11 = vpop.f32.mrf.mxu0 }
 0x2a7   :  { %v1743_v19 = vadd.f32 %v1742_v11, %v1692_v13  ;;  %v1702_v30 = vadd.f32 %v1701_v39, %v751_v63 }
 0x2a8   :  { %v1703_v48 = vpop.f32.mrf.mxu1  ;;  %v1744_v49 = vpop.f32.mrf.mxu0 }
 0x2a9   :  { %v1745_v20 = vadd.f32 %v1744_v49, %v1694_v15  ;;  %v4406_v48 = vld [vmem:[%s5883_s5 + $0xd8] sm:$0xff]  }
 0x2aa   :  { %v1704_v50 = vpop.f32.mrf.mxu1  ;;  %v1746_v52 = vpop.f32.mrf.mxu0  ;;  %3987 = vmatprep.subr.bf16.mxu0 %v4406_v48  ;;  %v4415_v48 = vld [vmem:[%s5883_s5 + $0x138] sm:$0xff]  }
 0x2ab   :  { %v1747_v23 = vadd.f32 %v1746_v52, %v1696_v2  ;;  %v4407_v52 = vld [vmem:[%s5883_s5 + $0x98] sm:$0xff]  }
 0x2ac   :  { %v1750_v56 = vpop.f32.mrf.mxu0  ;;  %3988 = vmatpush3.bf16.msra.mxu0 %v4407_v52 }
 0x2ad   :  { %v1751_v31 = vadd.f32 %v1750_v56, %v1700_v24 }
 0x2ae   :  { %v1752_v58 = vpop.f32.mrf.mxu0 }
 0x2af   :  { %v1753_v34 = vadd.f32 %v1752_v58, %v1702_v30 }
 0x2b0   :  { %v1754_v59 = vpop.f32.mrf.mxu0 }
 0x2b2   :  { %v1755_v60 = vpop.f32.mrf.mxu0 }
 0x2c4   :  { %v1842_v57 = vpop.f32.mrf.mxu0 }
 0x2c6   :  { %v1844_v8 = vpop.f32.mrf.mxu0 }
 0x2c8   :  { %v1846_v54 = vpop.f32.mrf.mxu0 }
 0x2ca   :  { %v1848_v61 = vpop.f32.mrf.mxu0 }
 0x2cc   :  { %v1852_v62 = vpop.f32.mrf.mxu0 }
 0x2ce   :  { %v5377_v51 = vpop.f32.mrf.mxu0 }
 0x2d0   :  { %v1856_v53 = vpop.f32.mrf.mxu0 }
 0x2d2   :  { %v1857_v1 = vpop.f32.mrf.mxu0 }
 0x2dc   :  { %v1791_v14 = vpop.f32.mrf.mxu1 }
 0x2dd   :  { %v1792_v37 = vadd.f32 %v1791_v14, %v1741_v45 }
 0x2de   :  { %v1793_v18 = vpop.f32.mrf.mxu1 }
 0x2df   :  { %v1794_v21 = vadd.f32 %v1793_v18, %v1743_v19  ;;  %v1843_v55 = vadd.f32 %v1842_v57, %v1792_v37  ;;  %v4410_v18 = vld [vmem:[%s5883_s5 + $0xc8] sm:$0xff]  }
 0x2e0   :  { %v1795_v22 = vpop.f32.mrf.mxu1 }
 0x2e1   :  { %v1796_v28 = vadd.f32 %v1795_v22, %v1745_v20  ;;  %v1845_v12 = vadd.f32 %v1844_v8, %v1794_v21  ;;  %v2051_v36 = vmax.f32 %v1843_v55, 0.0  ;;  %v4412_v55 = vld [vmem:[%s5883_s5 + $0xc0] sm:$0xff]  }
 0x2e2   :  { %v1797_v4 = vpop.f32.mrf.mxu1 }
 0x2e3   :  { %v1847_v32 = vadd.f32 %v1846_v54, %v1796_v28  ;;  %v1798_v33 = vadd.f32 %v1797_v4, %v1747_v23  ;;  %v2052_v42 = vmax.f32 %v1845_v12, 0.0 }
 0x2e4   :  { %v1801_v35 = vpop.f32.mrf.mxu1 }
 0x2e5   :  { %v2054_v38 = vmax.f32 %v1847_v32, 0.0  ;;  %v1849_v40 = vadd.f32 %v1848_v61, %v1798_v33  ;;  %v1802_v41 = vadd.f32 %v1801_v35, %v1751_v31  ;;  %v4413_v32 = vld [vmem:[%s5883_s5 + $0x80] sm:$0xff]  }
 0x2e6   :  { %v5414_v43 = vpop.f32.mrf.mxu0  ;;  %v1803_v44 = vpop.f32.mrf.mxu1 }
 0x2e7   :  { %v5416_v47 = vpack.c.bf16 %v2054_v38, %v2051_v36  ;;  %v2055_v46 = vmax.f32 %v1849_v40, 0.0  ;;  %v1853_v39 = vadd.f32 %v1852_v62, %v1802_v41  ;;  %v1804_v11 = vadd.f32 %v1803_v44, %v1753_v34 }
 0x2e8   :  { %v5421_v49 = vpop.f32.mrf.mxu0  ;;  %v1805_v50 = vpop.f32.mrf.mxu1 }
 0x2e9   :  { %v5426_v56 = vpack.c.bf16 %v2055_v46, %v2052_v42  ;;  %v2057_v58 = vmax.f32 %v1853_v39, 0.0  ;;  %v1855_v59 = vadd.f32 %v5377_v51, %v1804_v11  ;;  %v2067_v8 = vshrl.u32 %v5416_v47, 16  ;;  %v4408_v51 = vld [vmem:[%s5883_s5 + $0xd0] sm:$0xff]   ;;  %v4414_v11 = vld [vmem:[%s5883_s5 + $0x178] sm:$0xff]  }
 0x2ea   :  { %v5429_v60 = vpop.f32.mrf.mxu0  ;;  %v1806_v57 = vpop.f32.mrf.mxu1  ;;  %v2069_v54 = vshll.u32 %v5416_v47, 16  ;;  %3989 = vmatprep.subr.bf16.mxu0 %v4408_v51  ;;  %v4416_v50 = vld [vmem:[%s5883_s5 + $0x170] sm:$0xff]   ;;  %v2098_v52 = vrot.slane %v5416_v47, 1  ;;  %4001 = vmatprep.subr.bf16.mxu1 %v4414_v11 }
 0x2eb   :  { %v5433_v61 = vpack.c.bf16 %v2057_v58, %v2057_v58  ;;  %v2058_v62 = vmax.f32 %v1855_v59, 0.0  ;;  %v2074_v53 = vshrl.u32 %v5426_v56, 16  ;;  %v2076_v1 = vshll.u32 %v5426_v56, 16  ;;  %3990 = vmatpush3.bf16.msra.mxu0 %v4409_v6  ;;  %v4417_v58 = vld [vmem:[%s5883_s5 + $0x1f8] sm:$0xff]  }
 0x2ec   :  { %v5440_v3 = vpop.f32.mrf.mxu0  ;;  %v2071_v5 = vrot.slane %v2069_v54, 1  ;;  %v2109_v9 = vrot.slane %v2067_v8, 1  ;;  %v2110_v10 = vrot.slane %v2069_v54, 2  ;;  %3991 = vmatprep.subr.bf16.mxu0 %v4410_v18  ;;  %v4418_v54 = vld [vmem:[%s5883_s5 + $0x130] sm:$0xff]  }
 0x2ed   :  { %v2135_v7 = vshll.u32 %v5433_v61, 16  ;;  %v5446_v63 = vpack.c.bf16 %v2058_v62, %v2058_v62  ;;  %v2078_v45 = vrot.slane %v2076_v1, 1  ;;  %v2112_v17 = vrot.slane %v2074_v53, 1  ;;  %v4420_v62 = vld [vmem:[%s5883_s5 + $0x168] sm:$0xff]  }
 0x2ee   :  { %v5448_v26 = vpop.f32.mrf.mxu0  ;;  %v2072_v13 = vor.u32 %v2071_v5, %v2067_v8  ;;  %v2149_v14 = vshrl.u32 %v5433_v61, 16  ;;  %v2113_v21 = vrot.slane %v2076_v1, 2  ;;  %v5465_v30 = vor.u32 %v2110_v10, %v2109_v9  ;;  %v4422_v5 = vld [vmem:[%s5883_s5 + $0x128] sm:$0xff]   ;;  %v4426_v10 = vld [vmem:[%s5883_s5 + $0x120] sm:$0xff]  }
 0x2ef   :  { %v2201_v27 = vrot.slane %v2135_v7, 2  ;;  %v2140_v15 = vshll.u32 %v5446_v63, 16  ;;  %v2152_v19 = vshrl.u32 %v5446_v63, 16  ;;  %v2137_v37 = vrot.slane %v2135_v7, 1  ;;  %3992 = vmatpush3.bf16.msra.mxu0 %v4411_v16  ;;  %v4424_v7 = vld [vmem:[%s5883_s5 + $0x160] sm:$0xff]  }
 0x2f0   :  { %v5456_v2 = vpop.f32.mrf.mxu0  ;;  %v2200_v20 = vrot.slane %v2149_v14, 1  ;;  %v2079_v12 = vor.u32 %v2078_v45, %v2074_v53  ;;  %v5473_v33 = vor.u32 %v2113_v21, %v2112_v17  ;;  %3993 = vmatprep.subr.bf16.mxu0 %v4412_v55  ;;  %v2178_v39 = vrot.slane %v5433_v61, 1  ;;  %v4428_v17 = vld [vmem:[%s5883_s5 + $0x158] sm:$0xff]  }
 0x2f1   :  { %v2204_v22 = vrot.slane %v2152_v19, 1  ;;  %v2205_v24 = vrot.slane %v2140_v15, 2  ;;  %v2138_v23 = vsel %vm360_vm2, %v2072_v13, %v2137_v37  ;;  %v2142_v4 = vrot.slane %v2140_v15, 1 }
 0x2f2   :  { %v3916_v28 = vpop.f32.mrf.mxu0  ;;  %2158 = vrot.lane.b32.xlu0 %v2138_v23, %s4483_s1  ;;  %v5468_v31 = vor.u32 %v2201_v27, %v2200_v20  ;;  %v2151_v38 = vor.u32 %v2149_v14, %v2137_v37  ;;  %v2179_v57 = vsel %vm70_vm0, %v2098_v52, %v2178_v39  ;;  %v2180_v8 = vrot.slane %v5446_v63, 1 }
 0x2f3   :  { %v5475_v34 = vor.u32 %v2205_v24, %v2204_v22  ;;  %v2143_v36 = vsel %vm360_vm2, %v2079_v12, %v2142_v4  ;;  %3994 = vmatpush3.bf16.msra.mxu0 %v4413_v32  ;;  %v2154_v44 = vor.u32 %v2152_v19, %v2142_v4  ;;  %v2099_v53 = vrot.slane %v5426_v56, 1 }
 0x2f4   :  { %v3917_v35 = vpop.f32.mrf.mxu0  ;;  %v5481_v40 = vsel %vm419_vm3, %v5465_v30, %v5468_v31  ;;  %2160 = vrot.lane.b32.xlu1 %v2143_v36, %s4483_s1  ;;  %4023 = vmatprep.subr.bf16.mxu0 %v4417_v58  ;;  %v754_v37 = vsub.s32 2, %v4762_v25  ;;  %v3909_v24 = vadd.f32 %v5421_v49, %v5414_v43 }
 0x2f5   :  { %v5487_v41 = vsel %vm419_vm3, %v5473_v33, %v5475_v34  ;;  %v2393_v46 = vsel %vm2391_vm9, %v5416_v47, %v5481_v40  ;;  %v2181_v51 = vsel %vm70_vm0, %v2099_v53, %v2180_v8  ;;  %v3912_v35 = vadd.f32 %v5440_v3, %v5429_v60  ;;  %v4430_v60 = vld [vmem:[%s5883_s5 + $0x118] sm:$0xff]  }
 0x2f6   :  { %2164 = vrot.lane.b32.xlu0 %v2151_v38, %s4483_s1  ;;  %v2396_v42 = vsel %vm2391_vm9, %v5426_v56, %v5487_v41  ;;  %v755_v18 = vrot.slane %v5382_v0, %v754_v37 }
 0x2f7   :  { %3174 = vmatprep.mubr.bf16.mxu1 %v2396_v42 }
 0x2f8   :  { %3175 = vmatmul.mubr.bf16.vlgmr.msra.gmra.mxu1 %v2393_v46  ;;  %2166 = vrot.lane.b32.xlu1 %v2154_v44, %s4483_s1  ;;  %v3915_v46 = vadd.f32 %v5456_v2, %v5448_v26  ;;  %v4432_v2 = vld [vmem:[%s5883_s5 + $0x150] sm:$0xff]  }
 0x2f9   :  { %4002 = vmatpush3.bf16.msra.mxu1 %v4415_v48 }
 0x2fa   :  { %2087 = vrot.lane.b32.xlu0 %v2072_v13, %s4483_s1  ;;  %4003 = vmatprep.subr.bf16.mxu1 %v4416_v50 }
 0x2fc   :  { %v3879_v59 = vpop.f32.mrf.mxu1  ;;  %2089 = vrot.lane.b32.xlu1 %v2079_v12, %s4483_s1 }
 0x2fd   :  { %4004 = vmatpush3.bf16.msra.mxu1 %v4418_v54 }
 0x2fe   :  { %v3880_v61 = vpop.f32.mrf.mxu1  ;;  %2184 = vrot.lane.b32.xlu0 %v2179_v57, %s4482_s26  ;;  %4005 = vmatprep.subr.bf16.mxu1 %v4420_v62 }
 0x2ff   :  { %v3881_v20 = vadd.f32 %v3880_v61, %v3879_v59 }
 0x300   :  { %v3882_v1 = vpop.f32.mrf.mxu1  ;;  %2190 = vrot.lane.b32.xlu1 %v2178_v39, %s4482_s26 }
 0x301   :  { %4006 = vmatpush3.bf16.msra.mxu1 %v4422_v5  ;;  %v1894_v21 = vadd.f32 %v3881_v20, %v755_v18  ;;  %v4442_v20 = vld [vmem:[%s5883_s5 + $0x100] sm:$0xff]  }
 0x302   :  { %v3883_v6 = vpop.f32.mrf.mxu1  ;;  %2186 = vrot.lane.b32.xlu0 %v2181_v51, %s4482_s26  ;;  %4007 = vmatprep.subr.bf16.mxu1 %v4424_v7 }
 0x303   :  { %v3884_v16 = vadd.f32 %v3883_v6, %v3882_v1  ;;  %v1942_v12 = vadd.f32 %v3909_v24, %v1894_v21  ;;  %v4434_v1 = vld [vmem:[%s5883_s5 + $0x110] sm:$0xff]  }
 0x304   :  { %v3885_v9 = vpop.f32.mrf.mxu1 }
 0x305   :  { %4008 = vmatpush3.bf16.msra.mxu1 %v4426_v10  ;;  %v1897_v55 = vadd.f32 %v3884_v16, %v755_v18  ;;  %v4438_v10 = vld [vmem:[%s5883_s5 + $0x108] sm:$0xff]  }
 0x306   :  { %v4094_v13 = vpop.f32.mrf.mxu0  ;;  %v3886_v45 = vpop.f32.mrf.mxu1  ;;  %4009 = vmatprep.subr.bf16.mxu1 %v4428_v17 }
 0x307   :  { %v3887_v28 = vadd.f32 %v3886_v45, %v3885_v9  ;;  %v1945_v0 = vadd.f32 %v3912_v35, %v1897_v55  ;;  %v4436_v9 = vld [vmem:[%s5883_s5 + $0x148] sm:$0xff]  }
 0x308   :  { %v2037_v14 = vpop.f32.mrf.mxu0  ;;  %v3888_v27 = vpop.f32.mrf.mxu1 }
 0x309   :  { %v1902_v38 = vadd.f32 %v3887_v28, %v755_v18  ;;  %4010 = vmatpush3.bf16.msra.mxu1 %v4430_v60  ;;  %v4440_v18 = vld [vmem:[%s5883_s5 + $0x140] sm:$0xff]  }
 0x30a   :  { %v4095_v15 = vpop.f32.mrf.mxu0  ;;  %v3889_v19 = vpop.f32.mrf.mxu1  ;;  %4011 = vmatprep.subr.bf16.mxu1 %v4432_v2 }
 0x30b   :  { %v1950_v50 = vadd.f32 %v3915_v46, %v1902_v38 }
 0x30c   :  { %v2040_v49 = vpop.f32.mrf.mxu0 }
 0x30d   :  { %4012 = vmatpush3.bf16.msra.mxu1 %v4434_v1 }
 0x30e   :  { %4013 = vmatprep.subr.bf16.mxu1 %v4436_v9  ;;  %v4429_v9 = vld [vmem:[%s5883_s5 + $0x1e0] sm:$0xff]  }
 0x311   :  { %4014 = vmatpush3.bf16.msra.mxu1 %v4438_v10  ;;  %v4431_v10 = vld [vmem:[%s5883_s5 + $0x1a0] sm:$0xff]  }
 0x312   :  { %4015 = vmatprep.subr.bf16.mxu1 %v4440_v18  ;;  %v4486_v18 = vmov 0.0  }
 0x315   :  { %4016 = vmatpush3.bf16.msra.mxu1 %v4442_v20 }
 0x31c   :  { %v3935_v22 = vpop.f32.mrf.mxu1 }
 0x31e   :  { %v3936_v23 = vpop.f32.mrf.mxu1 }
 0x31f   :  { %v3937_v4 = vadd.f32 %v3936_v23, %v3935_v22  ;;  %v4445_v22 = vld [vmem:[%s5883_s5 + $0x278] sm:$0xff]  }
 0x320   :  { %v3938_v32 = vpop.f32.mrf.mxu1  ;;  %4045 = vmatprep.subr.bf16.mxu1 %v4445_v22 }
 0x321   :  { %v1990_v36 = vadd.f32 %v3937_v4, %v1942_v12 }
 0x322   :  { %v3939_v25 = vpop.f32.mrf.mxu1 }
 0x323   :  { %v3940_v42 = vadd.f32 %v3939_v25, %v3938_v32  ;;  %v2038_v39 = vadd.f32 %v2037_v14, %v1990_v36 }
 0x324   :  { %v3941_v44 = vpop.f32.mrf.mxu1 }
 0x325   :  { %v1993_v43 = vadd.f32 %v3940_v42, %v1945_v0  ;;  %v2053_v3 = vmax.f32 %v2038_v39, 0.0 }
 0x326   :  { %v3942_v11 = vpop.f32.mrf.mxu1 }
 0x327   :  { %v2041_v48 = vadd.f32 %v2040_v49, %v1993_v43  ;;  %v3943_v58 = vadd.f32 %v3942_v11, %v3941_v44 }
 0x328   :  { %v3944_v59 = vpop.f32.mrf.mxu1 }
 0x329   :  { %v2056_v57 = vmax.f32 %v2041_v48, 0.0  ;;  %v1998_v54 = vadd.f32 %v3943_v58, %v1950_v50 }
 0x32a   :  { %v3945_v61 = vpop.f32.mrf.mxu1 }
 0x32b   :  { %v5555_v62 = vpack.c.bf16 %v2056_v57, %v2053_v3  ;;  %v2046_v26 = vadd.f32 %v4094_v13, %v1998_v54 }
 0x32d   :  { %v2059_v51 = vmax.f32 %v2046_v26, 0.0  ;;  %v2083_v5 = vshll.u32 %v5555_v62, 16  ;;  %v2100_v13 = vrot.slane %v5555_v62, 1  ;;  %v2081_v17 = vshrl.u32 %v5555_v62, 16  ;;  %v4419_v26 = vld [vmem:[%s5883_s5 + $0x1b8] sm:$0xff]  }
 0x32f   :  { %v2065_v6 = vpack.c.bf16 %v2059_v51, %v2059_v51  ;;  %v2085_v7 = vrot.slane %v2083_v5, 1  ;;  %v2115_v24 = vrot.slane %v2081_v17, 1  ;;  %v2116_v47 = vrot.slane %v2083_v5, 2  ;;  %v4421_v51 = vld [vmem:[%s5883_s5 + $0x1f0] sm:$0xff]  }
 0x331   :  { %v2182_v45 = vrot.slane %v2065_v6, 1  ;;  %v2145_v14 = vshll.u32 %v2065_v6, 16  ;;  %v2086_v15 = vor.u32 %v2085_v7, %v2081_v17  ;;  %v2155_v37 = vshrl.u32 %v2065_v6, 16  ;;  %v4427_v7 = vld [vmem:[%s5883_s5 + $0x1a8] sm:$0xff]   ;;  %v4437_v17 = vld [vmem:[%s5883_s5 + $0x1d0] sm:$0xff]  }
 0x333   :  { %v2183_v27 = vsel %vm70_vm0, %v2100_v13, %v2182_v45  ;;  %v2147_v19 = vrot.slane %v2145_v14, 1  ;;  %v2208_v63 = vrot.slane %v2155_v37, 1 }
 0x334   :  { %2188 = vrot.lane.b32.xlu1 %v2183_v27, %s4482_s26  ;;  %v4441_v27 = vld [vmem:[%s5883_s5 + $0x1c8] sm:$0xff]  }
 0x335   :  { %v2148_v21 = vsel %vm360_vm2, %v2086_v15, %v2147_v19  ;;  %v2157_v16 = vor.u32 %v2155_v37, %v2147_v19  ;;  %v4444_v19 = vld [vmem:[%s5883_s5 + $0x1c0] sm:$0xff]  }
 0x336   :  { %2162 = vrot.lane.b32.xlu0 %v2148_v21, %s4483_s1  ;;  %v4446_v37 = vld [vmem:[%s5883_s5 + $0x180] sm:$0xff]  }
 0x338   :  { %2168 = vrot.lane.b32.xlu1 %v2157_v16, %s4483_s1 }
 0x33a   :  { %2192 = vrot.lane.b32.xlu0 %v2180_v8, %s4482_s26  ;;  %v2209_v8 = vrot.slane %v2145_v14, 2  ;;  %v4439_v14 = vld [vmem:[%s5883_s5 + $0x190] sm:$0xff]  }
 0x33c   :  { %2194 = vrot.lane.b32.xlu1 %v2182_v45, %s4482_s26  ;;  %v2210_v56 = vor.u32 %v2209_v8, %v2208_v63  ;;  %v4435_v45 = vld [vmem:[%s5883_s5 + $0x198] sm:$0xff]  }
 0x33e   :  { %2091 = vrot.lane.b32.xlu0 %v2086_v15, %s4483_s1  ;;  %v4443_v15 = vld [vmem:[%s5883_s5 + $0x188] sm:$0xff]  }
 0x340   :  { %2101 = vrot.lane.b32.xlu1 %v2098_v52, %s4482_s26  ;;  %v2117_v52 = vor.u32 %v2116_v47, %v2115_v24 }
 0x342   :  { %2103 = vrot.lane.b32.xlu0 %v2099_v53, %s4482_s26 }
 0x344   :  { %2105 = vrot.lane.b32.xlu1 %v2100_v13, %s4482_s26  ;;  %v4433_v13 = vld [vmem:[%s5883_s5 + $0x1d8] sm:$0xff]  }
 0x346   :  { %2212 = vrot.lane.b32.xlu0 %v5481_v40, %s4484_s0  ;;  %v2211_v40 = vsel %vm419_vm3, %v2117_v52, %v2210_v56 }
 0x348   :  { %2214 = vrot.lane.b32.xlu1 %v5487_v41, %s4484_s0 }
 0x34a   :  { %2218 = vrot.lane.b32.xlu0 %v5468_v31, %s4484_s0 }
 0x34c   :  { %2220 = vrot.lane.b32.xlu1 %v5475_v34, %s4484_s0 }
 0x34e   :  { %2118 = vrot.lane.b32.xlu0 %v5465_v30, %s4484_s0 }
 0x350   :  { %2120 = vrot.lane.b32.xlu1 %v5473_v33, %s4484_s0 }
 0x352   :  { %2216 = vrot.lane.b32.xlu0 %v2211_v40, %s4484_s0 }
 0x354   :  { %2222 = vrot.lane.b32.xlu1 %v2210_v56, %s4484_s0 }
 0x356   :  { %2122 = vrot.lane.b32.xlu0 %v2117_v52, %s4484_s0 }
 0x364   :  { %v2159_v31 = vpop.permute.xlu0 %2158 }
 0x365   :  { %v2229_v34 = vsel %vm320_vm7, %v5555_v62, %v2159_v31 }
 0x366   :  { %v2244_v41 = vshrl.u32 %v2229_v34, 16  ;;  %v5616_v53 = vpop.permute.xlu1 %2160  ;;  %v2247_v30 = vshll.u32 %v2229_v34, 16 }
 0x367   :  { %v2170_v23 = vsel %vm320_vm7, %v2159_v31, %v5616_v53 }
 0x368   :  { %v2165_v33 = vpop.permute.xlu0 %2164  ;;  %v2260_v55 = vshrl.u32 %v2170_v23, 16  ;;  %v2263_v28 = vshll.u32 %v2170_v23, 16  ;;  %v2246_v35 = vrot.slane %v2244_v41, 1  ;;  %v2249_v25 = vrot.slane %v2247_v30, 2 }
 0x369   :  { %v2231_v12 = vsel %vm320_vm7, %v2065_v6, %v2165_v33  ;;  %v4423_v6 = vld [vmem:[%s5883_s5 + $0x1b0] sm:$0xff]  }
 0x36a   :  { %v2251_v4 = vshrl.u32 %v2231_v12, 16  ;;  %v2254_v32 = vshll.u32 %v2231_v12, 16  ;;  %v5621_v36 = vpop.permute.xlu1 %2166  ;;  %v2262_v44 = vrot.slane %v2260_v55, 1  ;;  %v2265_v46 = vrot.slane %v2263_v28, 2 }
 0x36b   :  { %v2172_v42 = vsel %vm320_vm7, %v2165_v33, %v5621_v36  ;;  %v2250_v50 = vor.u32 %v2249_v25, %v2246_v35 }
 0x36c   :  { %v2253_v38 = vrot.slane %v2251_v4, 1  ;;  %v2256_v0 = vrot.slane %v2254_v32, 2  ;;  %v2268_v39 = vshrl.u32 %v2172_v42, 16  ;;  %v2271_v43 = vshll.u32 %v2172_v42, 16  ;;  %v2088_v3 = vpop.permute.xlu0 %2087 }
 0x36d   :  { %v2266_v59 = vor.u32 %v2265_v46, %v2262_v44  ;;  %v2127_v2 = vsel %vm320_vm7, %v5555_v62, %v2088_v3  ;;  %v4425_v62 = vld [vmem:[%s5883_s5 + $0x1e8] sm:$0xff]  }
 0x36e   :  { %v2257_v49 = vor.u32 %v2256_v0, %v2253_v38  ;;  %v2270_v11 = vrot.slane %v2268_v39, 1  ;;  %v2273_v48 = vrot.slane %v2271_v43, 2  ;;  %v5625_v58 = vpop.permute.xlu1 %2089 }
 0x36f   :  { %v2093_v54 = vsel %vm320_vm7, %v2088_v3, %v5625_v58 }
 0x370   :  { %v2274_v60 = vor.u32 %v2273_v48, %v2270_v11  ;;  %v2258_v57 = vsel %vm419_vm3, %v2250_v50, %v2257_v49  ;;  %v2185_v20 = vpop.permute.xlu0 %2184 }
 0x371   :  { %v2399_v5 = vsel %vm2391_vm9, %v2127_v2, %v2258_v57 }
 0x372   :  { %v2275_v61 = vsel %vm419_vm3, %v2266_v59, %v2274_v60  ;;  %v2191_v16 = vpop.permute.xlu1 %2190 }
 0x373   :  { %v2403_v1 = vsel %vm2391_vm9, %v2093_v54, %v2275_v61 }
 0x374   :  { %3215 = vmatprep.mubr.bf16.mxu0 %v2403_v1  ;;  %v2187_v21 = vpop.permute.xlu0 %2186 }
 0x375   :  { %3216 = vmatmul.mubr.bf16.vlgmr.msra.gmra.mxu0 %v2399_v5  ;;  %v2196_v22 = vsel %vm50_vm1, %v2185_v20, %v2187_v21 }
 0x376   :  { %4024 = vmatpush3.bf16.msra.mxu0 %v4419_v26  ;;  %v2309_v63 = vshrl.u32 %v2196_v22, 16  ;;  %v2312_v47 = vshll.u32 %v2196_v22, 16  ;;  %v4448_v22 = vld [vmem:[%s5883_s5 + $0x270] sm:$0xff]  }
 0x377   :  { %4025 = vmatprep.subr.bf16.mxu0 %v4421_v51 }
 0x378   :  { %v2311_v34 = vrot.slane %v2309_v63, 1  ;;  %v2314_v32 = vrot.slane %v2312_v47, 2 }
 0x37a   :  { %4026 = vmatpush3.bf16.msra.mxu0 %v4423_v6 }
 0x37b   :  { %4027 = vmatprep.subr.bf16.mxu0 %v4425_v62 }
 0x37e   :  { %4028 = vmatpush3.bf16.msra.mxu0 %v4427_v7 }
 0x37f   :  { %4029 = vmatprep.subr.bf16.mxu0 %v4429_v9 }
 0x382   :  { %4030 = vmatpush3.bf16.msra.mxu0 %v4431_v10 }
 0x383   :  { %4031 = vmatprep.subr.bf16.mxu0 %v4433_v13 }
 0x386   :  { %4032 = vmatpush3.bf16.msra.mxu0 %v4435_v45 }
 0x387   :  { %4033 = vmatprep.subr.bf16.mxu0 %v4437_v17 }
 0x38a   :  { %4034 = vmatpush3.bf16.msra.mxu0 %v4439_v14 }
 0x38b   :  { %4035 = vmatprep.subr.bf16.mxu0 %v4441_v27  ;;  %v2315_v27 = vor.u32 %v2314_v32, %v2311_v34 }
 0x38e   :  { %4036 = vmatpush3.bf16.msra.mxu0 %v4443_v15 }
 0x38f   :  { %4037 = vmatprep.subr.bf16.mxu0 %v4444_v19 }
 0x392   :  { %4038 = vmatpush3.bf16.msra.mxu0 %v4446_v37 }
 0x393   :  { %4096 = vmatprep.subr.bf16.mxu0 %v4486_v18 }
 0x3a6   :  { %v5682_v8 = vpop.permute.xlu1 %2188 }
 0x3a7   :  { %v2197_v24 = vsel %vm50_vm1, %v2187_v21, %v5682_v8 }
 0x3a8   :  { %v2163_v56 = vpop.permute.xlu0 %2162  ;;  %v2326_v52 = vshrl.u32 %v2197_v24, 16  ;;  %v2329_v41 = vshll.u32 %v2197_v24, 16 }
 0x3a9   :  { %v2171_v40 = vsel %vm320_vm7, %v5616_v53, %v2163_v56  ;;  %v2234_v31 = vsel %vm50_vm1, %v2163_v56, %v2185_v20  ;;  %v4447_v20 = vld [vmem:[%s5883_s5 + $0x238] sm:$0xff]  }
 0x3aa   :  { %v2277_v30 = vshrl.u32 %v2171_v40, 16  ;;  %v2280_v23 = vshll.u32 %v2171_v40, 16  ;;  %v2169_v33 = vpop.permute.xlu1 %2168  ;;  %v2293_v55 = vshrl.u32 %v2234_v31, 16  ;;  %v2296_v28 = vshll.u32 %v2234_v31, 16  ;;  %v4450_v31 = vld [vmem:[%s5883_s5 + $0x2b8] sm:$0xff]  }
 0x3ab   :  { %v2173_v12 = vsel %vm320_vm7, %v5621_v36, %v2169_v33  ;;  %v2237_v4 = vsel %vm50_vm1, %v2169_v33, %v2191_v16  ;;  %v2328_v53 = vrot.slane %v2326_v52, 1  ;;  %v2331_v50 = vrot.slane %v2329_v41, 2  ;;  %v4451_v33 = vld [vmem:[%s5883_s5 + $0x268] sm:$0xff]  }
 0x3ac   :  { %v2279_v35 = vrot.slane %v2277_v30, 1  ;;  %v2282_v25 = vrot.slane %v2280_v23, 2  ;;  %v2285_v38 = vshrl.u32 %v2173_v12, 16  ;;  %v2193_v0 = vpop.permute.xlu0 %2192  ;;  %v2295_v42 = vrot.slane %v2293_v55, 1  ;;  %v4449_v30 = vld [vmem:[%s5883_s5 + $0x230] sm:$0xff]  }
 0x3ad   :  { %v2288_v44 = vshll.u32 %v2173_v12, 16  ;;  %v2300_v46 = vshrl.u32 %v2237_v4, 16  ;;  %v2298_v39 = vrot.slane %v2296_v28, 2  ;;  %v2303_v49 = vshll.u32 %v2237_v4, 16  ;;  %v4453_v12 = vld [vmem:[%s5883_s5 + $0x2b0] sm:$0xff]  }
 0x3ae   :  { %v2287_v43 = vrot.slane %v2285_v38, 1  ;;  %v2198_v11 = vsel %vm50_vm1, %v2191_v16, %v2193_v0  ;;  %v5693_v48 = vpop.permute.xlu1 %2194  ;;  %v2283_v3 = vor.u32 %v2282_v25, %v2279_v35  ;;  %v2332_v21 = vor.u32 %v2331_v50, %v2328_v53  ;;  %v4452_v25 = vld [vmem:[%s5883_s5 + $0x228] sm:$0xff]   ;;  %v4454_v38 = vld [vmem:[%s5883_s5 + $0x260] sm:$0xff]   ;;  %v4457_v50 = vld [vmem:[%s5883_s5 + $0x258] sm:$0xff]  }
 0x3af   :  { %v2290_v36 = vrot.slane %v2288_v44, 2  ;;  %v2302_v59 = vrot.slane %v2300_v46, 1  ;;  %v2317_v60 = vshrl.u32 %v2198_v11, 16  ;;  %v2305_v57 = vrot.slane %v2303_v49, 2 }
 0x3b0   :  { %v2320_v54 = vshll.u32 %v2198_v11, 16  ;;  %v2199_v61 = vsel %vm50_vm1, %v2193_v0, %v5693_v48  ;;  %v2092_v26 = vpop.permute.xlu0 %2091  ;;  %v2299_v6 = vor.u32 %v2298_v39, %v2295_v42  ;;  %v4456_v42 = vld [vmem:[%s5883_s5 + $0x2a8] sm:$0xff]   ;;  %v4455_v11 = vld [vmem:[%s5883_s5 + $0x220] sm:$0xff]  }
 0x3b1   :  { %v2291_v2 = vor.u32 %v2290_v36, %v2287_v43  ;;  %v2319_v1 = vrot.slane %v2317_v60, 1  ;;  %v2334_v51 = vshrl.u32 %v2199_v61, 16  ;;  %v2337_v5 = vshll.u32 %v2199_v61, 16 }
 0x3b2   :  { %v2306_v62 = vor.u32 %v2305_v57, %v2302_v59  ;;  %v2322_v7 = vrot.slane %v2320_v54, 2  ;;  %v2094_v9 = vsel %vm320_vm7, %v5625_v58, %v2092_v26  ;;  %v2102_v10 = vpop.permute.xlu1 %2101 }
 0x3b3   :  { %v2336_v13 = vrot.slane %v2334_v51, 1  ;;  %v2339_v45 = vrot.slane %v2337_v5, 2  ;;  %v2130_v17 = vsel %vm50_vm1, %v2092_v26, %v2102_v10  ;;  %v2292_v14 = vsel %vm419_vm3, %v2283_v3, %v2291_v2  ;;  %v4459_v3 = vld [vmem:[%s5883_s5 + $0x2a0] sm:$0xff]   ;;  %v4458_v26 = vld [vmem:[%s5883_s5 + $0x218] sm:$0xff]   ;;  %v4460_v2 = vld [vmem:[%s5883_s5 + $0x250] sm:$0xff]  }
 0x3b4   :  { %v2323_v15 = vor.u32 %v2322_v7, %v2319_v1  ;;  %v2104_v19 = vpop.permute.xlu0 %2103  ;;  %v2307_v37 = vsel %vm419_vm3, %v2299_v6, %v2306_v62  ;;  %v2407_v47 = vsel %vm2391_vm9, %v2094_v9, %v2292_v14 }
 0x3b5   :  { %v2340_v16 = vor.u32 %v2339_v45, %v2336_v13  ;;  %v2410_v58 = vsel %vm2391_vm9, %v2130_v17, %v2307_v37  ;;  %v2107_v63 = vsel %vm50_vm1, %v2102_v10, %v2104_v19  ;;  %v4462_v13 = vld [vmem:[%s5883_s5 + $0x298] sm:$0xff]  }
 0x3b6   :  { %3256 = vmatprep.mubr.bf16.mxu1 %v2410_v58  ;;  %v5710_v24 = vpop.permute.xlu1 %2105  ;;  %v2324_v56 = vsel %vm419_vm3, %v2315_v27, %v2323_v15  ;;  %v4463_v27 = vld [vmem:[%s5883_s5 + $0x248] sm:$0xff]  }
 0x3b7   :  { %v2108_v52 = vsel %vm50_vm1, %v2104_v19, %v5710_v24  ;;  %3257 = vmatmul.mubr.bf16.vlgmr.msra.gmra.mxu1 %v2407_v47  ;;  %v2341_v40 = vsel %vm419_vm3, %v2332_v21, %v2340_v16  ;;  %v2414_v23 = vsel %vm2391_vm9, %v2107_v63, %v2324_v56  ;;  %v4465_v21 = vld [vmem:[%s5883_s5 + $0x290] sm:$0xff]   ;;  %v4466_v56 = vld [vmem:[%s5883_s5 + $0x240] sm:$0xff]  }
 0x3b8   :  { %4046 = vmatpush3.bf16.msra.mxu1 %v4447_v20  ;;  %v2213_v34 = vpop.permute.xlu0 %2212  ;;  %v2418_v41 = vsel %vm2391_vm9, %v2108_v52, %v2341_v40 }
 0x3b9   :  { %3297 = vmatprep.mubr.bf16.mxu0 %v2418_v41  ;;  %4047 = vmatprep.subr.bf16.mxu1 %v4448_v22  ;;  %v2240_v1 = vsel %vm344_vm8, %v5682_v8, %v2213_v34  ;;  %v4461_v8 = vld [vmem:[%s5883_s5 + $0x210] sm:$0xff]   ;;  %v4464_v22 = vld [vmem:[%s5883_s5 + $0x208] sm:$0xff]  }
 0x3ba   :  { %v2215_v55 = vpop.permute.xlu1 %2214  ;;  %3298 = vmatmul.mubr.bf16.vlgmr.msra.gmra.mxu0 %v2414_v23  ;;  %v2342_v45 = vshrl.u32 %v2240_v1, 16  ;;  %v2345_v17 = vshll.u32 %v2240_v1, 16  ;;  %v4467_v23 = vld [vmem:[%s5883_s5 + $0x200] sm:$0xff]  }
 0x3bb   :  { %v2224_v28 = vsel %vm344_vm8, %v2213_v34, %v2215_v55  ;;  %4097 = vmatpush3.bf16.msra.mxu0 %v4450_v31  ;;  %4112 = vmatprep.mubr.msk.bf16.mxu0 %vm4487_vm10, %v4486_v18  ;;  %v4468_v34 = vld [vmem:[%s5883_s5 + $0x288] sm:$0xff]  }
 0x3bc   :  { %v2358_v4 = vshrl.u32 %v2224_v28, 16  ;;  %v2361_v32 = vshll.u32 %v2224_v28, 16  ;;  %4048 = vmatpush3.bf16.msra.mxu1 %v4449_v30  ;;  %v2219_v35 = vpop.permute.xlu0 %2218  ;;  %4098 = vmatprep.subr.bf16.mxu0 %v4486_v18  ;;  %v2344_v63 = vrot.slane %v2342_v45, 1  ;;  %v2347_v47 = vrot.slane %v2345_v17, 2 }
 0x3bd   :  { %4049 = vmatprep.subr.bf16.mxu1 %v4451_v33  ;;  %v2243_v54 = vsel %vm344_vm8, %v5693_v48, %v2219_v35 }
 0x3be   :  { %v2221_v0 = vpop.permute.xlu1 %2220  ;;  %v2360_v44 = vrot.slane %v2358_v4, 1  ;;  %v2363_v46 = vrot.slane %v2361_v32, 2  ;;  %v2349_v62 = vshrl.u32 %v2243_v54, 16  ;;  %v2352_v7 = vshll.u32 %v2243_v54, 16 }
 0x3bf   :  { %v2226_v53 = vsel %vm344_vm8, %v2219_v35, %v2221_v0  ;;  %4099 = vmatpush3.bf16.msra.mxu0 %v4453_v12  ;;  %v2348_v33 = vor.u32 %v2347_v47, %v2344_v63  ;;  %v4469_v12 = vld [vmem:[%s5883_s5 + $0x280] sm:$0xff]  }
 0x3c0   :  { %v2366_v39 = vshrl.u32 %v2226_v53, 16  ;;  %v2369_v43 = vshll.u32 %v2226_v53, 16  ;;  %4050 = vmatpush3.bf16.msra.mxu1 %v4452_v25  ;;  %v5744_v49 = vpop.permute.xlu0 %2118  ;;  %4100 = vmatprep.subr.bf16.mxu0 %v4486_v18  ;;  %v2364_v57 = vor.u32 %v2363_v46, %v2360_v44  ;;  %v2351_v37 = vrot.slane %v2349_v62, 1  ;;  %v4473_v44 = vld [vmem:[%s5885_s7 + $0x20] sm:$0xff]   ;;  %v4474_v46 = vld [vmem:[%s5885_s7 + $0x18] sm:$0xff]  }
 0x3c1   :  { %4051 = vmatprep.subr.bf16.mxu1 %v4454_v38  ;;  %v2354_v20 = vrot.slane %v2352_v7, 2  ;;  %v2133_v32 = vsel %vm344_vm8, %v5710_v24, %v5744_v49  ;;  %v4471_v24 = vld [vmem:[%s5885_s7 + $0x30] sm:$0xff]   ;;  %v3760_v62 = vld [vmem:[%s5886_s6] ss:$0 sm:$0xff] }
 0x3c2   :  { %v2368_v36 = vrot.slane %v2366_v39, 1  ;;  %v2371_v59 = vrot.slane %v2369_v43, 2  ;;  %v5753_v60 = vpop.permute.xlu1 %2120  ;;  %v4475_v39 = vld [vmem:[%s5885_s7 + $0x10] sm:$0xff]   ;;  %v4476_v43 = vld [vmem:[%s5885_s7 + $0x8] sm:$0xff]  }
 0x3c3   :  { %4101 = vmatpush3.bf16.msra.mxu0 %v4456_v42  ;;  %v2124_v48 = vsel %vm344_vm8, %v5744_v49, %v5753_v60  ;;  %v2355_v31 = vor.u32 %v2354_v20, %v2351_v37  ;;  %v4472_v42 = vld [vmem:[%s5885_s7 + $0x28] sm:$0xff]   ;;  %v4477_v49 = vld [vmem:[%s5885_s7] sm:$0xff]  }
 0x3c4   :  { %v2372_v61 = vor.u32 %v2371_v59, %v2368_v36  ;;  %4052 = vmatpush3.bf16.msra.mxu1 %v4455_v11  ;;  %4102 = vmatprep.subr.bf16.mxu0 %v4486_v18  ;;  %v2217_v51 = vpop.permute.xlu0 %2216  ;;  %v4478_v11 = vld [vmem:[%s5885_s7 + $0x58] sm:$0xff]   ;;  %v4480_v36 = vld [vmem:[%s5885_s7 + $0x48] sm:$0xff]   ;;  %v3973_v59 = vpop.f32.mrf.mxu1 }
 0x3c5   :  { %4053 = vmatprep.subr.bf16.mxu1 %v4457_v50  ;;  %v2225_v14 = vsel %vm344_vm8, %v2215_v55, %v2217_v51  ;;  %v2356_v28 = vsel %vm419_vm3, %v2348_v33, %v2355_v31  ;;  %v4479_v50 = vld [vmem:[%s5885_s7 + $0x50] sm:$0xff]  }
 0x3c6   :  { %v2223_v5 = vpop.permute.xlu1 %2222  ;;  %v2373_v6 = vsel %vm419_vm3, %v2364_v57, %v2372_v61  ;;  %v2375_v16 = vshrl.u32 %v2225_v14, 16  ;;  %v2378_v58 = vshll.u32 %v2225_v14, 16  ;;  %v2421_v25 = vsel %vm2391_vm9, %v2133_v32, %v2356_v28  ;;  %v4481_v32 = vld [vmem:[%s5885_s7 + $0x40] sm:$0xff]  }
 0x3c7   :  { %v2227_v9 = vsel %vm344_vm8, %v2221_v0, %v2223_v5  ;;  %4103 = vmatpush3.bf16.msra.mxu0 %v4459_v3  ;;  %v2425_v10 = vsel %vm2391_vm9, %v2124_v48, %v2373_v6  ;;  %v3974_v3 = vpop.f32.mrf.mxu1 }
 0x3c8   :  { %4054 = vmatpush3.bf16.msra.mxu1 %v4458_v26  ;;  %3338 = vmatprep.mubr.bf16.mxu1 %v2425_v10  ;;  %v2383_v15 = vshrl.u32 %v2227_v9, 16  ;;  %v2386_v19 = vshll.u32 %v2227_v9, 16  ;;  %v2377_v41 = vrot.slane %v2375_v16, 1  ;;  %v2380_v30 = vrot.slane %v2378_v58, 2  ;;  %v2123_v35 = vpop.permute.xlu0 %2122 }
 0x3c9   :  { %4055 = vmatprep.subr.bf16.mxu1 %v4460_v2  ;;  %4104 = vmatprep.subr.bf16.mxu0 %v4486_v18  ;;  %v2125_v0 = vsel %vm344_vm8, %v5753_v60, %v2123_v35  ;;  %v3976_v54 = vpop.f32.mrf.mxu1  ;;  %v3975_v6 = vadd.f32 %v3974_v3, %v3973_v59 }
 0x3ca   :  { %v2385_v52 = vrot.slane %v2383_v15, 1  ;;  %v2388_v40 = vrot.slane %v2386_v19, 2  ;;  %v2381_v4 = vor.u32 %v2380_v30, %v2377_v41 }
 0x3cb   :  { %4105 = vmatpush3.bf16.msra.mxu0 %v4462_v13  ;;  %v3977_v26 = vpop.f32.mrf.mxu1  ;;  %v3177_v10 = vadd.f32 %v3975_v6, %v3760_v62 }
 0x3cc   :  { %4056 = vmatpush3.bf16.msra.mxu1 %v4461_v8  ;;  %4106 = vmatprep.subr.bf16.mxu0 %v4486_v18  ;;  %v2389_v55 = vor.u32 %v2388_v40, %v2385_v52  ;;  %v3978_v13 = vadd.f32 %v3977_v26, %v3976_v54 }
 0x3cd   :  { %4057 = vmatprep.subr.bf16.mxu1 %v4463_v27 }
 0x3ce   :  { %v2390_v38 = vsel %vm419_vm3, %v2381_v4, %v2389_v55  ;;  %v3180_v37 = vadd.f32 %v3978_v13, %v3760_v62 }
 0x3cf   :  { %4107 = vmatpush3.bf16.msra.mxu0 %v4465_v21  ;;  %v2429_v53 = vsel %vm2391_vm9, %v2125_v0, %v2390_v38 }
 0x3d0   :  { %4058 = vmatpush3.bf16.msra.mxu1 %v4464_v22  ;;  %4108 = vmatprep.subr.bf16.mxu0 %v4486_v18 }
 0x3d1   :  { %4059 = vmatprep.subr.bf16.mxu1 %v4466_v56 }
 0x3d3   :  { %4109 = vmatpush3.bf16.msra.mxu0 %v4468_v34 }
 0x3d4   :  { %4060 = vmatpush3.bf16.msra.mxu1 %v4467_v23  ;;  %4110 = vmatprep.subr.bf16.mxu0 %v4486_v18  ;;  %v4470_v18 = vld [vmem:[%s5885_s7 + $0x38] sm:$0xff]  }
 0x3d5   :  { %3519 = vmatprep.subr.bf16.mxu1 %v4485_v29 }
 0x3d7   :  { %3339 = vmatmul.mubr.bf16.vlgmr.msra.gmra.mxu1 %v2421_v25  ;;  %4111 = vmatpush3.bf16.msra.mxu0 %v4469_v12 }
 0x3d8   :  { %3520 = vmatpush1.bf16.msra.mxu1 %v4470_v18 }
 0x3d9   :  { %3521 = vmatprep.subr.bf16.mxu1 %v4485_v29 }
 0x3da   :  { %4113 = vmatmul.mubr.bf16.vlgmr.msra.gmra.mxu0 %v2429_v53 }
 0x3dc   :  { %3522 = vmatpush1.bf16.msra.mxu1 %v4471_v24 }
 0x3dd   :  { %3523 = vmatprep.subr.bf16.mxu1 %v4485_v29 }
 0x3e0   :  { %3524 = vmatpush1.bf16.msra.mxu1 %v4472_v42 }
 0x3e1   :  { %3525 = vmatprep.subr.bf16.mxu1 %v4485_v29 }
 0x3e4   :  { %3526 = vmatpush1.bf16.msra.mxu1 %v4473_v44 }
 0x3e5   :  { %3527 = vmatprep.subr.bf16.mxu1 %v4485_v29 }
 0x3e8   :  { %3528 = vmatpush1.bf16.msra.mxu1 %v4474_v46 }
 0x3e9   :  { %3529 = vmatprep.subr.bf16.mxu1 %v4485_v29 }
 0x3ec   :  { %3530 = vmatpush1.bf16.msra.mxu1 %v4475_v39 }
 0x3ed   :  { %3531 = vmatprep.subr.bf16.mxu1 %v4485_v29 }
 0x3f0   :  { %3532 = vmatpush1.bf16.msra.mxu1 %v4476_v43 }
 0x3f1   :  { %3533 = vmatprep.subr.bf16.mxu1 %v4485_v29 }
 0x3f4   :  { %3534 = vmatpush1.bf16.msra.mxu1 %v4477_v49 }
 0x3f5   :  { %3543 = vmatprep.subr.bf16.mxu1 %v4485_v29 }
 0x3f8   :  { %3544 = vmatpush2.bf16.msra.mxu1 %v4478_v11 }
 0x3f9   :  { %3545 = vmatprep.subr.bf16.mxu1 %v4485_v29 }
 0x3fc   :  { %3546 = vmatpush2.bf16.msra.mxu1 %v4479_v50  ;;  %v3849_v50 = vld [vmem:[%s5887_s8] ss:$0 sm:$0xff] }
 0x3fd   :  { %3547 = vmatprep.subr.bf16.mxu1 %v4485_v29 }
 0x400   :  { %3548 = vmatpush2.bf16.msra.mxu1 %v4480_v36 }
 0x401   :  { %3549 = vmatprep.subr.bf16.mxu1 %v4485_v29 }
 0x404   :  { %3550 = vmatpush2.bf16.msra.mxu1 %v4481_v32 }
 0x435   :  { %v3995_v60 = vpop.f32.mrf.mxu0 }
 0x437   :  { %v3996_v57 = vpop.f32.mrf.mxu0 }
 0x438   :  { %v3997_v9 = vadd.f32 %v3996_v57, %v3995_v60 }
 0x439   :  { %v3998_v61 = vpop.f32.mrf.mxu0 }
 0x43a   :  { %v3218_v17 = vadd.f32 %v3997_v9, %v3177_v10 }
 0x43b   :  { %v3999_v2 = vpop.f32.mrf.mxu0 }
 0x43c   :  { %v4000_v14 = vadd.f32 %v3999_v2, %v3998_v61 }
 0x43e   :  { %v3221_v58 = vadd.f32 %v4000_v14, %v3180_v37 }
 0x477   :  { %v4017_v1 = vpop.f32.mrf.mxu1 }
 0x479   :  { %v4018_v51 = vpop.f32.mrf.mxu1 }
 0x47a   :  { %v4039_v48 = vpop.f32.mrf.mxu0  ;;  %v4019_v8 = vadd.f32 %v4018_v51, %v4017_v1 }
 0x47b   :  { %v4020_v7 = vpop.f32.mrf.mxu1 }
 0x47c   :  { %v4040_v5 = vpop.f32.mrf.mxu0  ;;  %v3259_v20 = vadd.f32 %v4019_v8, %v3218_v17 }
 0x47d   :  { %v4021_v45 = vpop.f32.mrf.mxu1  ;;  %v4041_v27 = vadd.f32 %v4040_v5, %v4039_v48 }
 0x47e   :  { %v4042_v29 = vpop.f32.mrf.mxu0  ;;  %v4022_v21 = vadd.f32 %v4021_v45, %v4020_v7 }
 0x47f   :  { %v3300_v22 = vadd.f32 %v4041_v27, %v3259_v20 }
 0x480   :  { %v4043_v15 = vpop.f32.mrf.mxu0  ;;  %v3262_v40 = vadd.f32 %v4022_v21, %v3221_v58 }
 0x481   :  { %v4044_v63 = vadd.f32 %v4043_v15, %v4042_v29 }
 0x483   :  { %v3303_v30 = vadd.f32 %v4044_v63, %v3262_v40 }
 0x497   :  { %v4061_v19 = vpop.f32.mrf.mxu1 }
 0x499   :  { %v4062_v16 = vpop.f32.mrf.mxu1 }
 0x49a   :  { %v4063_v47 = vadd.f32 %v4062_v16, %v4061_v19  ;;  %v3381_v56 = vpop.f32.mrf.mxu0 }
 0x49b   :  { %v4064_v52 = vpop.f32.mrf.mxu1 }
 0x49c   :  { %v3341_v31 = vadd.f32 %v4063_v47, %v3300_v22  ;;  %v4114_v34 = vpop.f32.mrf.mxu0 }
 0x49d   :  { %v4065_v41 = vpop.f32.mrf.mxu1 }
 0x49e   :  { %v4066_v23 = vadd.f32 %v4065_v41, %v4064_v52  ;;  %v3384_v33 = vpop.f32.mrf.mxu0  ;;  %v3382_v55 = vadd.f32 %v3381_v56, %v3341_v31 }
 0x4a0   :  { %v3344_v28 = vadd.f32 %v4066_v23, %v3303_v30  ;;  %v4115_v12 = vpop.f32.mrf.mxu0  ;;  %v3388_v35 = vmax.f32 %v3382_v55, 0.0 }
 0x4a2   :  { %v3385_v4 = vadd.f32 %v3384_v33, %v3344_v28 }
 0x4a4   :  { %v3389_v25 = vmax.f32 %v3385_v4, 0.0 }
 0x4a6   :  { %v3390_v38 = vpack.c.bf16 %v3389_v25, %v3388_v35 }
 0x4a8   :  { %v3401_v0 = vrot.slane %v3390_v38, 1  ;;  %v3394_v53 = vshll.u32 %v3390_v38, 16  ;;  %v3392_v24 = vshrl.u32 %v3390_v38, 16 }
 0x4aa   :  { %v3406_v18 = vrot.slane %v3401_v0, 1  ;;  %v3396_v42 = vrot.slane %v3394_v53, 1 }
 0x4ac   :  { %v3413_v44 = vsel %vm3407_vm11, %v3401_v0, %v3406_v18  ;;  %v3397_v46 = vor.u32 %v3396_v42, %v3392_v24 }
 0x4ad   :  { %3862 = vmatprep.mubr.msk.bf16.mxu1 %vm50_vm1, %v3413_v44 }
 0x4ae   :  { %3398 = vrot.lane.b32.xlu1 %v3397_v46, %s4482_s26 }
 0x520   :  { %v3399_v39 = vpop.permute.xlu1 %3398 }
 0x521   :  { %v3403_v43 = vsel %vm50_vm1, %v3390_v38, %v3399_v39 }
 0x522   :  { %v3405_v49 = vrot.slane %v3403_v43, 1 }
 0x524   :  { %v3409_v11 = vsel %vm3407_vm11, %v3403_v43, %v3405_v49 }
 0x525   :  { %3552 = vmatmul.mubr.bf16.vlgmr.msra.gmra.mxu1 %v3409_v11 }
 0x5e5   :  { %v3553_v36 = vpop.f32.mrf.mxu1 }
 0x5e6   :  { %v3554_v59 = vadd.f32 %v3849_v50, %v3553_v36 }
 0x5e7   :  { %v3555_v60 = vpop.f32.mrf.mxu1 }
 0x5e8   :  { %3560 = vst [vmem:[%s5888_s9] sm:$0xff] %v3554_v59 }
 0x5e9   :  { %v3556_v3 = vpop.f32.mrf.mxu1 }
 0x5ea   :  { %v3557_v57 = vadd.f32 %v3849_v50, %v3556_v3 }
 0x5eb   :  { %v3558_v54 = vpop.f32.mrf.mxu1 }
 0x5ec   :  { %3561 = vst [vmem:[%s5888_s9 + $0x8] sm:$0xf] %v3557_v57 }

</bundles_post_ra>
